<compile_context>
chip_gen: v7x
topology: tpu7x:2x2x1
jax: 0.10.0
libtpu: 0.0.40
codegen_flags: <defaults>
</compile_context>

<pallas_src>
from functools import partial

import jax
import jax.numpy as jnp
from jax.experimental import pallas as pl
from jax.experimental.pallas import tpu as pltpu


# ---------------------------------------------------------------------------
# Fused sin/cos with shared Cody-Waite range reduction (valid for 0 <= t <~ 1e4;
# here t = bucket_index * (1/inv_freq) <= 999).
# ---------------------------------------------------------------------------
_TWO_OVER_PI = 0.636619772367581343
_PIO2_HI = 1.5703125                      # pi/2 = HI + MD + LO (Cody-Waite split)
_PIO2_MD = 4.837512969970703125e-4
_PIO2_LO = 7.5497899548918821e-8
_S1, _S2, _S3 = -1.6666654611e-1, 8.3321608736e-3, -1.9515295891e-4
_C1, _C2, _C3 = 4.166664568298827e-2, -1.388731625493765e-3, 2.443315711809948e-5


def _sincos(t):
    """Return (sin(t), cos(t)) sharing one range reduction (t >= 0)."""
    n = jnp.floor(t * _TWO_OVER_PI + 0.5)
    r = t - n * _PIO2_HI
    r = r - n * _PIO2_MD
    r = r - n * _PIO2_LO
    q = n.astype(jnp.int32)                   # quadrant
    z = r * r
    poly_s = _S1 + z * (_S2 + z * _S3)
    sin_r = r + r * z * poly_s
    poly_c = _C1 + z * (_C2 + z * _C3)
    cos_r = 1.0 - 0.5 * z + (z * z) * poly_c
    swap = (q & 1) == 1                       # odd quadrant: sin/cos swap roles
    sin_base = jnp.where(swap, cos_r, sin_r)
    cos_base = jnp.where(swap, sin_r, cos_r)
    sin_t = jnp.where((q & 2) == 2, -sin_base, sin_base)
    cos_t = jnp.where(((q + 1) & 2) == 2, -cos_base, cos_base)
    return sin_t, cos_t


# ---------------------------------------------------------------------------
# Kernel
# ---------------------------------------------------------------------------
def _pe_kernel(xy_ref, rinv_ref, mnb_ref, out_ref, *, transpose_out):
    """xy_ref:  (2, tile_n) raw coords, points on lanes (x = row 0, y = row 1).
    rinv_ref: (L2, 1) reciprocals of the L2 distinct inverse frequencies.
    mnb_ref:  (2, 2)  [[min_x, bucket_x], [min_y, bucket_y]].
    out_ref:  (tile_n, feat_dim) if transpose_out else (feat_dim, tile_n)."""
    tile_n = xy_ref.shape[1]
    L2 = rinv_ref.shape[0]
    feat_dim = out_ref.shape[1] if transpose_out else out_ref.shape[0]
    gap = feat_dim - 4 * L2

    rinv = rinv_ref[...]                      # (L2, 1)
    mn = mnb_ref[:, 0:1]                      # (2, 1) per-coordinate minima
    bkt = mnb_ref[:, 1:2]                     # (2, 1) per-coordinate bucket sizes

    # One-shot discretization of both coordinates on the dense (2, tile_n) block.
    # TODO(synk): bucket == 0 (degenerate coordinate) yields Inf/NaN, matching torch.
    d = jnp.clip(jnp.floor((xy_ref[...] - mn) / bkt), 0.0, 999.0)     # (2, tile_n)

    rows = []
    for c in range(2):                        # x then y
        # freq on sublanes (L2 = 8 for feat_dim = 32 -> fully dense vregs), points on lanes.
        t = d[c:c + 1, :] * rinv                                      # (L2, tile_n)
        s, co = _sincos(t)                    # one shared range reduction per freq pair
        for j in range(L2):                   # interleave [sin f_j, cos f_j, ...]
            rows.append(s[j:j + 1, :])
            rows.append(co[j:j + 1, :])
    if gap > 0:
        # TODO(synk): torch pads along dim=1, which equals the feature dim only for 2-D input.
        rows.append(jnp.zeros((gap, tile_n), jnp.float32))

    pe = jnp.concatenate(rows, axis=0)                                # (feat_dim, tile_n)

    if transpose_out:
        # XLU transpose, different VLIW slot than the VALU-bound sin chain -> near free;
        # removes the wrapper-side transpose's extra HBM pass.
        out_ref[...] = jnp.transpose(pe).astype(out_ref.dtype)        # (tile_n, feat_dim)
    else:
        out_ref[...] = pe.astype(out_ref.dtype)                       # lane-dense layout


# ---------------------------------------------------------------------------
# Wrapper
# ---------------------------------------------------------------------------
def _pick_tile_n(n, max_tile_n):
    max_tile_n = max(128, (max_tile_n // 128) * 128)
    # Largest tile that still gives >= 2 grid steps (v7x has 2 TensorCores), rounded to 128.
    half = pl.cdiv(pl.cdiv(n, 2), 128) * 128
    return max(128, min(max_tile_n, half))


@partial(jax.jit, static_argnames=("feat_dim", "pos_temperature", "max_tile_n",
                                   "transposed_output", "out_dtype"))
def pe_forward(coors, feat_dim=32, pos_temperature=10000.0, max_tile_n=4096,
               transposed_output=True, out_dtype=jnp.float32):
    """Pallas equivalent of PE.forward (normalize_pos=False) for 2-D (N, C) coors.

    transposed_output=True  -> (N, feat_dim), same as the torch module.
    transposed_output=False -> lane-dense (feat_dim, N) for consumers that absorb the layout.
    """
    assert coors.ndim == 2, "this Pallas port handles unbatched (N, C) coors"
    N = coors.shape[0]
    L2 = feat_dim // 4                       # distinct frequencies per coordinate
    L = 2 * L2                               # per-coordinate embedding width (pos_length)

    xy = coors[:, :2].astype(jnp.float32)    # (N, 2)

    # Tiny global reduction + per-channel constants: plain XLA glue, fused under jit.
    mn = jnp.min(xy, axis=0)                 # (2,)
    mx = jnp.max(xy, axis=0)                 # (2,)
    bucket = (mx - mn) / 1000.0              # same formula as the torch reference
    mnb = jnp.stack([mn, bucket], axis=-1)   # (2, 2)

    idx = jnp.arange(L2, dtype=jnp.float32)
    inv_freq = pos_temperature ** (2.0 * idx / L)           # distinct inverse frequencies
    rinv = (1.0 / inv_freq).reshape(L2, 1).astype(jnp.float32)

    tile_n = _pick_tile_n(N, max_tile_n)
    n_pad = pl.cdiv(N, tile_n) * tile_n
    xy_t = jnp.pad(xy.T, ((0, 0), (0, n_pad - N)))          # (2, n_pad) lane-dense input

    if transposed_output:
        out_shape = jax.ShapeDtypeStruct((n_pad, feat_dim), out_dtype)
        out_specs = pl.BlockSpec((tile_n, feat_dim), lambda i: (i, 0))
    else:
        out_shape = jax.ShapeDtypeStruct((feat_dim, n_pad), out_dtype)
        out_specs = pl.BlockSpec((feat_dim, tile_n), lambda i: (0, i))

    pe = pl.pallas_call(
        partial(_pe_kernel, transpose_out=transposed_output),
        out_shape=out_shape,
        grid=(n_pad // tile_n,),
        in_specs=[
            pl.BlockSpec((2, tile_n), lambda i: (0, i)),
            pl.BlockSpec((L2, 1), lambda i: (0, 0)),
            pl.BlockSpec((2, 2), lambda i: (0, 0)),
        ],
        out_specs=out_specs,
        compiler_params=pltpu.CompilerParams(
            dimension_semantics=("parallel",)),
    )(xy_t, rinv, mnb)

    if transposed_output:
        return pe[:N, :]                     # (N, feat_dim); no transpose needed
    return pe[:, :N]                         # (feat_dim, N) lane-dense layout


# ---------------------------------------------------------------------------
# Pure-JAX reference mirroring the PyTorch module
# ---------------------------------------------------------------------------
def pe_reference(coors, feat_dim=32, pos_temperature=10000.0):
    xy = coors[:, :2].astype(jnp.float32)
    mn = jnp.min(xy, axis=0)
    mx = jnp.max(xy, axis=0)
    bucket = (mx - mn) / 1000.0
    dis = jnp.clip(jnp.floor((xy - mn) / bucket), 0.0, 999.0)
    L = feat_dim // 4 * 2
    idx = jnp.arange(L, dtype=jnp.float32)
    inv_freq = pos_temperature ** (2.0 * jnp.floor(idx / 2.0) / L)
    pex = dis[:, 0:1] / inv_freq[None, :]
    pey = dis[:, 1:2] / inv_freq[None, :]

    def interleave(p):
        return jnp.stack(
            [jnp.sin(p[:, ::2]), jnp.cos(p[:, 1::2])], axis=-1
        ).reshape(p.shape[0], -1)

    pe = jnp.concatenate([interleave(pex), interleave(pey)], axis=-1)
    gap = feat_dim - pe.shape[-1]
    if gap > 0:
        pe = jnp.concatenate([pe, jnp.zeros((pe.shape[0], gap), jnp.float32)], axis=-1)
    return pe


if __name__ == "__main__":
    key = jax.random.PRNGKey(0)
    N, C, FEAT_DIM = 2048, 3, 32   # h_dim = 32
    coors = jax.random.uniform(key, (N, C), dtype=jnp.float32, minval=-50.0, maxval=50.0)

    ref = pe_reference(coors, feat_dim=FEAT_DIM)

    # Default path: (N, feat_dim) output, transpose done in-kernel, wrapper fully jitted.
    pe = jax.block_until_ready(pe_forward(coors, feat_dim=FEAT_DIM))
    assert pe.shape == (N, FEAT_DIM) and pe.dtype == jnp.float32
    # atol covers the hand-rolled sincos and reciprocal-multiply-vs-divide rounding
    # at discretized arguments up to 999 (bounded ~1e-4); semantics are unchanged.
    assert jnp.allclose(pe, ref, rtol=1e-5, atol=5e-4), "mismatch vs reference ((N, feat) path)"

    # Lane-dense (feat_dim, N) output for consumers that can absorb the layout
    # (preferred on v5e / when a following matmul takes it via dot_general dims).
    pe_t = jax.block_until_ready(pe_forward(coors, feat_dim=FEAT_DIM, transposed_output=False))
    assert pe_t.shape == (FEAT_DIM, N)
    assert jnp.allclose(pe_t.T, ref, rtol=1e-5, atol=5e-4), "mismatch vs reference (lane-dense path)"

    print("KERNEL_OK")
</pallas_src>

<mosaic_0001>
module attributes {stable_mosaic.version = 11 : i64} {
  func.func @_pe_kernel(%arg0: i32, %arg1: memref<2x1024xf32, #tpu.memory_space<vmem>>, %arg2: memref<8x1xf32, #tpu.memory_space<vmem>>, %arg3: memref<2x2xf32, #tpu.memory_space<vmem>>, %arg4: memref<1024x32xf32, #tpu.memory_space<vmem>>) attributes {dimension_semantics = [#tpu.dimension_semantics<parallel>], iteration_bounds = array<i64: 2>, scalar_prefetch = 0 : i64, scratch_operands = 0 : i64, tpu.core_type = #tpu.core_type<tc>, window_params = [{transform_indices = @transform_0, window_bounds = array<i64: 2, 1024>}, {pipeline_mode = #tpu.pipeline_mode<synchronous>, transform_indices = @transform_1, window_bounds = array<i64: 8, 1>}, {pipeline_mode = #tpu.pipeline_mode<synchronous>, transform_indices = @transform_2, window_bounds = array<i64: 2, 2>}, {transform_indices = @transform_3, window_bounds = array<i64: 1024, 32>}]} {
    %c0 = arith.constant 0 : index
    %c0_0 = arith.constant 0 : index
    %0 = vector.load %arg2[%c0, %c0_0] : memref<8x1xf32, #tpu.memory_space<vmem>>, vector<8x1xf32>
    %c0_1 = arith.constant 0 : index
    %c0_2 = arith.constant 0 : index
    %1 = vector.load %arg3[%c0_1, %c0_2] : memref<2x2xf32, #tpu.memory_space<vmem>>, vector<2x1xf32>
    %c0_3 = arith.constant 0 : index
    %c1 = arith.constant 1 : index
    %2 = vector.load %arg3[%c0_3, %c1] : memref<2x2xf32, #tpu.memory_space<vmem>>, vector<2x1xf32>
    %c0_4 = arith.constant 0 : index
    %c0_5 = arith.constant 0 : index
    %3 = vector.load %arg1[%c0_4, %c0_5] : memref<2x1024xf32, #tpu.memory_space<vmem>>, vector<2x1024xf32>
    %4 = vector.broadcast %1 : vector<2x1xf32> to vector<2x1024xf32>
    %5 = arith.subf %3, %4 : vector<2x1024xf32>
    %6 = vector.broadcast %2 : vector<2x1xf32> to vector<2x1024xf32>
    %7 = arith.divf %5, %6 : vector<2x1024xf32>
    %8 = math.floor %7 : vector<2x1024xf32>
    %cst = arith.constant 0.000000e+00 : f32
    %cst_6 = arith.constant 9.990000e+02 : f32
    %9 = vector.broadcast %cst : f32 to vector<2x1024xf32>
    %10 = arith.maximumf %9, %8 : vector<2x1024xf32>
    %11 = vector.broadcast %cst_6 : f32 to vector<2x1024xf32>
    %12 = arith.minimumf %11, %10 : vector<2x1024xf32>
    %13 = vector.extract_strided_slice %12 {offsets = [0, 0], sizes = [1, 1024], strides = [1, 1]} : vector<2x1024xf32> to vector<1x1024xf32>
    %14 = vector.broadcast %13 : vector<1x1024xf32> to vector<8x1024xf32>
    %15 = vector.broadcast %0 : vector<8x1xf32> to vector<8x1024xf32>
    %16 = arith.mulf %14, %15 : vector<8x1024xf32>
    %cst_7 = arith.constant 0.636619746 : f32
    %17 = vector.broadcast %cst_7 : f32 to vector<8x1024xf32>
    %18 = arith.mulf %16, %17 : vector<8x1024xf32>
    %cst_8 = arith.constant 5.000000e-01 : f32
    %19 = vector.broadcast %cst_8 : f32 to vector<8x1024xf32>
    %20 = arith.addf %18, %19 : vector<8x1024xf32>
    %21 = math.floor %20 : vector<8x1024xf32>
    %cst_9 = arith.constant 1.5703125 : f32
    %22 = vector.broadcast %cst_9 : f32 to vector<8x1024xf32>
    %23 = arith.mulf %21, %22 : vector<8x1024xf32>
    %24 = arith.subf %16, %23 : vector<8x1024xf32>
    %cst_10 = arith.constant 4.83751297E-4 : f32
    %25 = vector.broadcast %cst_10 : f32 to vector<8x1024xf32>
    %26 = arith.mulf %21, %25 : vector<8x1024xf32>
    %27 = arith.subf %24, %26 : vector<8x1024xf32>
    %cst_11 = arith.constant 7.549790e-08 : f32
    %28 = vector.broadcast %cst_11 : f32 to vector<8x1024xf32>
    %29 = arith.mulf %21, %28 : vector<8x1024xf32>
    %30 = arith.subf %27, %29 : vector<8x1024xf32>
    %31 = arith.fptosi %21 : vector<8x1024xf32> to vector<8x1024xi32>
    %32 = arith.mulf %30, %30 : vector<8x1024xf32>
    %cst_12 = arith.constant -1.95152956E-4 : f32
    %33 = vector.broadcast %cst_12 : f32 to vector<8x1024xf32>
    %34 = arith.mulf %32, %33 : vector<8x1024xf32>
    %cst_13 = arith.constant 0.00833216123 : f32
    %35 = vector.broadcast %cst_13 : f32 to vector<8x1024xf32>
    %36 = arith.addf %35, %34 : vector<8x1024xf32>
    %37 = arith.mulf %32, %36 : vector<8x1024xf32>
    %cst_14 = arith.constant -0.166666552 : f32
    %38 = vector.broadcast %cst_14 : f32 to vector<8x1024xf32>
    %39 = arith.addf %38, %37 : vector<8x1024xf32>
    %40 = arith.mulf %30, %32 : vector<8x1024xf32>
    %41 = arith.mulf %40, %39 : vector<8x1024xf32>
    %42 = arith.addf %30, %41 : vector<8x1024xf32>
    %cst_15 = arith.constant 2.44331568E-5 : f32
    %43 = vector.broadcast %cst_15 : f32 to vector<8x1024xf32>
    %44 = arith.mulf %32, %43 : vector<8x1024xf32>
    %cst_16 = arith.constant -0.00138873165 : f32
    %45 = vector.broadcast %cst_16 : f32 to vector<8x1024xf32>
    %46 = arith.addf %45, %44 : vector<8x1024xf32>
    %47 = arith.mulf %32, %46 : vector<8x1024xf32>
    %cst_17 = arith.constant 0.0416666456 : f32
    %48 = vector.broadcast %cst_17 : f32 to vector<8x1024xf32>
    %49 = arith.addf %48, %47 : vector<8x1024xf32>
    %cst_18 = arith.constant 5.000000e-01 : f32
    %50 = vector.broadcast %cst_18 : f32 to vector<8x1024xf32>
    %51 = arith.mulf %50, %32 : vector<8x1024xf32>
    %cst_19 = arith.constant 1.000000e+00 : f32
    %52 = vector.broadcast %cst_19 : f32 to vector<8x1024xf32>
    %53 = arith.subf %52, %51 : vector<8x1024xf32>
    %54 = arith.mulf %32, %32 : vector<8x1024xf32>
    %55 = arith.mulf %54, %49 : vector<8x1024xf32>
    %56 = arith.addf %53, %55 : vector<8x1024xf32>
    %c1_i32 = arith.constant 1 : i32
    %57 = vector.broadcast %c1_i32 : i32 to vector<8x1024xi32>
    %58 = arith.andi %31, %57 : vector<8x1024xi32>
    %c1_i32_20 = arith.constant 1 : i32
    %59 = vector.broadcast %c1_i32_20 : i32 to vector<8x1024xi32>
    %60 = arith.cmpi eq, %58, %59 : vector<8x1024xi32>
    %61 = arith.select %60, %56, %42 : vector<8x1024xi1>, vector<8x1024xf32>
    %62 = arith.select %60, %42, %56 : vector<8x1024xi1>, vector<8x1024xf32>
    %c2_i32 = arith.constant 2 : i32
    %63 = vector.broadcast %c2_i32 : i32 to vector<8x1024xi32>
    %64 = arith.andi %31, %63 : vector<8x1024xi32>
    %c2_i32_21 = arith.constant 2 : i32
    %65 = vector.broadcast %c2_i32_21 : i32 to vector<8x1024xi32>
    %66 = arith.cmpi eq, %64, %65 : vector<8x1024xi32>
    %cst_22 = arith.constant 0.000000e+00 : f32
    %67 = vector.broadcast %cst_22 : f32 to vector<8x1024xf32>
    %68 = arith.subf %67, %61 : vector<8x1024xf32>
    %69 = arith.select %66, %68, %61 : vector<8x1024xi1>, vector<8x1024xf32>
    %c1_i32_23 = arith.constant 1 : i32
    %70 = vector.broadcast %c1_i32_23 : i32 to vector<8x1024xi32>
    %71 = arith.addi %31, %70 : vector<8x1024xi32>
    %c2_i32_24 = arith.constant 2 : i32
    %72 = vector.broadcast %c2_i32_24 : i32 to vector<8x1024xi32>
    %73 = arith.andi %71, %72 : vector<8x1024xi32>
    %c2_i32_25 = arith.constant 2 : i32
    %74 = vector.broadcast %c2_i32_25 : i32 to vector<8x1024xi32>
    %75 = arith.cmpi eq, %73, %74 : vector<8x1024xi32>
    %cst_26 = arith.constant 0.000000e+00 : f32
    %76 = vector.broadcast %cst_26 : f32 to vector<8x1024xf32>
    %77 = arith.subf %76, %62 : vector<8x1024xf32>
    %78 = arith.select %75, %77, %62 : vector<8x1024xi1>, vector<8x1024xf32>
    %79 = vector.extract_strided_slice %69 {offsets = [0, 0], sizes = [1, 1024], strides = [1, 1]} : vector<8x1024xf32> to vector<1x1024xf32>
    %80 = vector.extract_strided_slice %78 {offsets = [0, 0], sizes = [1, 1024], strides = [1, 1]} : vector<8x1024xf32> to vector<1x1024xf32>
    %81 = vector.extract_strided_slice %69 {offsets = [1, 0], sizes = [1, 1024], strides = [1, 1]} : vector<8x1024xf32> to vector<1x1024xf32>
    %82 = vector.extract_strided_slice %78 {offsets = [1, 0], sizes = [1, 1024], strides = [1, 1]} : vector<8x1024xf32> to vector<1x1024xf32>
    %83 = vector.extract_strided_slice %69 {offsets = [2, 0], sizes = [1, 1024], strides = [1, 1]} : vector<8x1024xf32> to vector<1x1024xf32>
    %84 = vector.extract_strided_slice %78 {offsets = [2, 0], sizes = [1, 1024], strides = [1, 1]} : vector<8x1024xf32> to vector<1x1024xf32>
    %85 = vector.extract_strided_slice %69 {offsets = [3, 0], sizes = [1, 1024], strides = [1, 1]} : vector<8x1024xf32> to vector<1x1024xf32>
    %86 = vector.extract_strided_slice %78 {offsets = [3, 0], sizes = [1, 1024], strides = [1, 1]} : vector<8x1024xf32> to vector<1x1024xf32>
    %87 = vector.extract_strided_slice %69 {offsets = [4, 0], sizes = [1, 1024], strides = [1, 1]} : vector<8x1024xf32> to vector<1x1024xf32>
    %88 = vector.extract_strided_slice %78 {offsets = [4, 0], sizes = [1, 1024], strides = [1, 1]} : vector<8x1024xf32> to vector<1x1024xf32>
    %89 = vector.extract_strided_slice %69 {offsets = [5, 0], sizes = [1, 1024], strides = [1, 1]} : vector<8x1024xf32> to vector<1x1024xf32>
    %90 = vector.extract_strided_slice %78 {offsets = [5, 0], sizes = [1, 1024], strides = [1, 1]} : vector<8x1024xf32> to vector<1x1024xf32>
    %91 = vector.extract_strided_slice %69 {offsets = [6, 0], sizes = [1, 1024], strides = [1, 1]} : vector<8x1024xf32> to vector<1x1024xf32>
    %92 = vector.extract_strided_slice %78 {offsets = [6, 0], sizes = [1, 1024], strides = [1, 1]} : vector<8x1024xf32> to vector<1x1024xf32>
    %93 = vector.extract_strided_slice %69 {offsets = [7, 0], sizes = [1, 1024], strides = [1, 1]} : vector<8x1024xf32> to vector<1x1024xf32>
    %94 = vector.extract_strided_slice %78 {offsets = [7, 0], sizes = [1, 1024], strides = [1, 1]} : vector<8x1024xf32> to vector<1x1024xf32>
    %95 = vector.extract_strided_slice %12 {offsets = [1, 0], sizes = [1, 1024], strides = [1, 1]} : vector<2x1024xf32> to vector<1x1024xf32>
    %96 = vector.broadcast %95 : vector<1x1024xf32> to vector<8x1024xf32>
    %97 = vector.broadcast %0 : vector<8x1xf32> to vector<8x1024xf32>
    %98 = arith.mulf %96, %97 : vector<8x1024xf32>
    %cst_27 = arith.constant 0.636619746 : f32
    %99 = vector.broadcast %cst_27 : f32 to vector<8x1024xf32>
    %100 = arith.mulf %98, %99 : vector<8x1024xf32>
    %cst_28 = arith.constant 5.000000e-01 : f32
    %101 = vector.broadcast %cst_28 : f32 to vector<8x1024xf32>
    %102 = arith.addf %100, %101 : vector<8x1024xf32>
    %103 = math.floor %102 : vector<8x1024xf32>
    %cst_29 = arith.constant 1.5703125 : f32
    %104 = vector.broadcast %cst_29 : f32 to vector<8x1024xf32>
    %105 = arith.mulf %103, %104 : vector<8x1024xf32>
    %106 = arith.subf %98, %105 : vector<8x1024xf32>
    %cst_30 = arith.constant 4.83751297E-4 : f32
    %107 = vector.broadcast %cst_30 : f32 to vector<8x1024xf32>
    %108 = arith.mulf %103, %107 : vector<8x1024xf32>
    %109 = arith.subf %106, %108 : vector<8x1024xf32>
    %cst_31 = arith.constant 7.549790e-08 : f32
    %110 = vector.broadcast %cst_31 : f32 to vector<8x1024xf32>
    %111 = arith.mulf %103, %110 : vector<8x1024xf32>
    %112 = arith.subf %109, %111 : vector<8x1024xf32>
    %113 = arith.fptosi %103 : vector<8x1024xf32> to vector<8x1024xi32>
    %114 = arith.mulf %112, %112 : vector<8x1024xf32>
    %cst_32 = arith.constant -1.95152956E-4 : f32
    %115 = vector.broadcast %cst_32 : f32 to vector<8x1024xf32>
    %116 = arith.mulf %114, %115 : vector<8x1024xf32>
    %cst_33 = arith.constant 0.00833216123 : f32
    %117 = vector.broadcast %cst_33 : f32 to vector<8x1024xf32>
    %118 = arith.addf %117, %116 : vector<8x1024xf32>
    %119 = arith.mulf %114, %118 : vector<8x1024xf32>
    %cst_34 = arith.constant -0.166666552 : f32
    %120 = vector.broadcast %cst_34 : f32 to vector<8x1024xf32>
    %121 = arith.addf %120, %119 : vector<8x1024xf32>
    %122 = arith.mulf %112, %114 : vector<8x1024xf32>
    %123 = arith.mulf %122, %121 : vector<8x1024xf32>
    %124 = arith.addf %112, %123 : vector<8x1024xf32>
    %cst_35 = arith.constant 2.44331568E-5 : f32
    %125 = vector.broadcast %cst_35 : f32 to vector<8x1024xf32>
    %126 = arith.mulf %114, %125 : vector<8x1024xf32>
    %cst_36 = arith.constant -0.00138873165 : f32
    %127 = vector.broadcast %cst_36 : f32 to vector<8x1024xf32>
    %128 = arith.addf %127, %126 : vector<8x1024xf32>
    %129 = arith.mulf %114, %128 : vector<8x1024xf32>
    %cst_37 = arith.constant 0.0416666456 : f32
    %130 = vector.broadcast %cst_37 : f32 to vector<8x1024xf32>
    %131 = arith.addf %130, %129 : vector<8x1024xf32>
    %cst_38 = arith.constant 5.000000e-01 : f32
    %132 = vector.broadcast %cst_38 : f32 to vector<8x1024xf32>
    %133 = arith.mulf %132, %114 : vector<8x1024xf32>
    %cst_39 = arith.constant 1.000000e+00 : f32
    %134 = vector.broadcast %cst_39 : f32 to vector<8x1024xf32>
    %135 = arith.subf %134, %133 : vector<8x1024xf32>
    %136 = arith.mulf %114, %114 : vector<8x1024xf32>
    %137 = arith.mulf %136, %131 : vector<8x1024xf32>
    %138 = arith.addf %135, %137 : vector<8x1024xf32>
    %c1_i32_40 = arith.constant 1 : i32
    %139 = vector.broadcast %c1_i32_40 : i32 to vector<8x1024xi32>
    %140 = arith.andi %113, %139 : vector<8x1024xi32>
    %c1_i32_41 = arith.constant 1 : i32
    %141 = vector.broadcast %c1_i32_41 : i32 to vector<8x1024xi32>
    %142 = arith.cmpi eq, %140, %141 : vector<8x1024xi32>
    %143 = arith.select %142, %138, %124 : vector<8x1024xi1>, vector<8x1024xf32>
    %144 = arith.select %142, %124, %138 : vector<8x1024xi1>, vector<8x1024xf32>
    %c2_i32_42 = arith.constant 2 : i32
    %145 = vector.broadcast %c2_i32_42 : i32 to vector<8x1024xi32>
    %146 = arith.andi %113, %145 : vector<8x1024xi32>
    %c2_i32_43 = arith.constant 2 : i32
    %147 = vector.broadcast %c2_i32_43 : i32 to vector<8x1024xi32>
    %148 = arith.cmpi eq, %146, %147 : vector<8x1024xi32>
    %cst_44 = arith.constant 0.000000e+00 : f32
    %149 = vector.broadcast %cst_44 : f32 to vector<8x1024xf32>
    %150 = arith.subf %149, %143 : vector<8x1024xf32>
    %151 = arith.select %148, %150, %143 : vector<8x1024xi1>, vector<8x1024xf32>
    %c1_i32_45 = arith.constant 1 : i32
    %152 = vector.broadcast %c1_i32_45 : i32 to vector<8x1024xi32>
    %153 = arith.addi %113, %152 : vector<8x1024xi32>
    %c2_i32_46 = arith.constant 2 : i32
    %154 = vector.broadcast %c2_i32_46 : i32 to vector<8x1024xi32>
    %155 = arith.andi %153, %154 : vector<8x1024xi32>
    %c2_i32_47 = arith.constant 2 : i32
    %156 = vector.broadcast %c2_i32_47 : i32 to vector<8x1024xi32>
    %157 = arith.cmpi eq, %155, %156 : vector<8x1024xi32>
    %cst_48 = arith.constant 0.000000e+00 : f32
    %158 = vector.broadcast %cst_48 : f32 to vector<8x1024xf32>
    %159 = arith.subf %158, %144 : vector<8x1024xf32>
    %160 = arith.select %157, %159, %144 : vector<8x1024xi1>, vector<8x1024xf32>
    %161 = vector.extract_strided_slice %151 {offsets = [0, 0], sizes = [1, 1024], strides = [1, 1]} : vector<8x1024xf32> to vector<1x1024xf32>
    %162 = vector.extract_strided_slice %160 {offsets = [0, 0], sizes = [1, 1024], strides = [1, 1]} : vector<8x1024xf32> to vector<1x1024xf32>
    %163 = vector.extract_strided_slice %151 {offsets = [1, 0], sizes = [1, 1024], strides = [1, 1]} : vector<8x1024xf32> to vector<1x1024xf32>
    %164 = vector.extract_strided_slice %160 {offsets = [1, 0], sizes = [1, 1024], strides = [1, 1]} : vector<8x1024xf32> to vector<1x1024xf32>
    %165 = vector.extract_strided_slice %151 {offsets = [2, 0], sizes = [1, 1024], strides = [1, 1]} : vector<8x1024xf32> to vector<1x1024xf32>
    %166 = vector.extract_strided_slice %160 {offsets = [2, 0], sizes = [1, 1024], strides = [1, 1]} : vector<8x1024xf32> to vector<1x1024xf32>
    %167 = vector.extract_strided_slice %151 {offsets = [3, 0], sizes = [1, 1024], strides = [1, 1]} : vector<8x1024xf32> to vector<1x1024xf32>
    %168 = vector.extract_strided_slice %160 {offsets = [3, 0], sizes = [1, 1024], strides = [1, 1]} : vector<8x1024xf32> to vector<1x1024xf32>
    %169 = vector.extract_strided_slice %151 {offsets = [4, 0], sizes = [1, 1024], strides = [1, 1]} : vector<8x1024xf32> to vector<1x1024xf32>
    %170 = vector.extract_strided_slice %160 {offsets = [4, 0], sizes = [1, 1024], strides = [1, 1]} : vector<8x1024xf32> to vector<1x1024xf32>
    %171 = vector.extract_strided_slice %151 {offsets = [5, 0], sizes = [1, 1024], strides = [1, 1]} : vector<8x1024xf32> to vector<1x1024xf32>
    %172 = vector.extract_strided_slice %160 {offsets = [5, 0], sizes = [1, 1024], strides = [1, 1]} : vector<8x1024xf32> to vector<1x1024xf32>
    %173 = vector.extract_strided_slice %151 {offsets = [6, 0], sizes = [1, 1024], strides = [1, 1]} : vector<8x1024xf32> to vector<1x1024xf32>
    %174 = vector.extract_strided_slice %160 {offsets = [6, 0], sizes = [1, 1024], strides = [1, 1]} : vector<8x1024xf32> to vector<1x1024xf32>
    %175 = vector.extract_strided_slice %151 {offsets = [7, 0], sizes = [1, 1024], strides = [1, 1]} : vector<8x1024xf32> to vector<1x1024xf32>
    %176 = vector.extract_strided_slice %160 {offsets = [7, 0], sizes = [1, 1024], strides = [1, 1]} : vector<8x1024xf32> to vector<1x1024xf32>
    %177 = tpu.concatenate %79, %80, %81, %82, %83, %84, %85, %86, %87, %88, %89, %90, %91, %92, %93, %94 in 0 : vector<1x1024xf32>, vector<1x1024xf32>, vector<1x1024xf32>, vector<1x1024xf32>, vector<1x1024xf32>, vector<1x1024xf32>, vector<1x1024xf32>, vector<1x1024xf32>, vector<1x1024xf32>, vector<1x1024xf32>, vector<1x1024xf32>, vector<1x1024xf32>, vector<1x1024xf32>, vector<1x1024xf32>, vector<1x1024xf32>, vector<1x1024xf32> -> vector<16x1024xf32>
    %178 = tpu.concatenate %161, %162, %163, %164, %165, %166, %167, %168, %169, %170, %171, %172, %173, %174, %175, %176 in 0 : vector<1x1024xf32>, vector<1x1024xf32>, vector<1x1024xf32>, vector<1x1024xf32>, vector<1x1024xf32>, vector<1x1024xf32>, vector<1x1024xf32>, vector<1x1024xf32>, vector<1x1024xf32>, vector<1x1024xf32>, vector<1x1024xf32>, vector<1x1024xf32>, vector<1x1024xf32>, vector<1x1024xf32>, vector<1x1024xf32>, vector<1x1024xf32> -> vector<16x1024xf32>
    %179 = tpu.concatenate %177, %178 in 0 : vector<16x1024xf32>, vector<16x1024xf32> -> vector<32x1024xf32>
    %180 = tpu.transpose %179, [1, 0] : vector<32x1024xf32> -> vector<1024x32xf32>
    %c0_49 = arith.constant 0 : index
    %c0_50 = arith.constant 0 : index
    %181 = vector.load %arg4[%c0_49, %c0_50] : memref<1024x32xf32, #tpu.memory_space<vmem>>, vector<1024x32xf32>
    tpu.vector_store %arg4[%c0_49, %c0_50], %180 {strides = array<i32>} : memref<1024x32xf32, #tpu.memory_space<vmem>>, vector<1024x32xf32>,
    return
  }
  func.func @transform_0(%arg0: i32) -> (i32, i32) {
    %c0_i32 = arith.constant 0 : i32
    %c0_i32_0 = arith.constant 0 : i32
    return %c0_i32, %arg0 : i32, i32
  }
  func.func @transform_1(%arg0: i32) -> (i32, i32) {
    %c0_i32 = arith.constant 0 : i32
    %c0_i32_0 = arith.constant 0 : i32
    %c0_i32_1 = arith.constant 0 : i32
    return %c0_i32, %c0_i32_0 : i32, i32
  }
  func.func @transform_2(%arg0: i32) -> (i32, i32) {
    %c0_i32 = arith.constant 0 : i32
    %c0_i32_0 = arith.constant 0 : i32
    %c0_i32_1 = arith.constant 0 : i32
    return %c0_i32, %c0_i32_0 : i32, i32
  }
  func.func @transform_3(%arg0: i32) -> (i32, i32) {
    %c0_i32 = arith.constant 0 : i32
    %c0_i32_0 = arith.constant 0 : i32
    return %arg0, %c0_i32 : i32, i32
  }
}

</mosaic_0001>

<bundles_post_ra>
// kernel: pe_forward.1
= control target key start
LH: loop header
LB: loop body
LE: loop exit
PB: predicated region body
PF: predicated region fallthrough
CT: control target
= control target key end

     0   :  { %s2263_s12 = smov 0   ;;  %s3532_s0 = inlined_call_operand.vmem [shape: f32[2,2048], index: 0, kind: input, shape index: {}]   ;;  %s3533_s1 = inlined_call_operand.vmem [shape: f32[8,1], index: 1, kind: input, shape index: {}]   ;;  %s3534_s2 = inlined_call_operand.vmem [shape: f32[2,2], index: 2, kind: input, shape index: {}]   ;;  %s3535_s3 = inlined_call_operand.vmem [shape: f32[2048,32], index: 3, kind: output, shape index: {}]  }
   0x1 LB: > { %s2171_s13 = sadd.s32 4294967295, %s2238_s12   ;;  %p2175_p0 = scmp.ge.s32.totalorder %s2238_s12, 1  ;;  %s2238_s12 = sphi %s2263_s12, %s13_s12  }
   0x2   : > { %p138_p1 = scmp.lt.s32.totalorder %s2238_s12, 3 }
   0x4   : > { %p139_p2 = pnand %p2175_p0, %p138_p1 }
   0x5   : > { %v175_v0 = vld [vmem:[%s3534_s2] sm:$0x3] (!%p139_p2)  ;;  %v2240_v2 = vmov (!%p139_p2), 0   ;;  %v2241_v3 = vmov (!%p139_p2), 1   ;;  %s2176_s18 = sshll.u32 (!%p139_p2), %s2171_s13, 3  ;;  %v185_v6 = vlaneseq (!%p139_p2)  ;;  %vm1259_vm4 = vcmask (!%p139_p2), 1040384  }
   0x6   : > { %142 = sbr.rel (%p139_p2) target bundleno = 636 (0x27c), region = 32  ;;  %v174_v1 = vld [vmem:[%s3533_s1] sm:$0xff] (!%p139_p2)  ;;  %2226 = vset.pattern.permute.xlu0 (!%p139_p2), %v2240_v2  ;;  %2228 = vset.pattern.permute.xlu1 (!%p139_p2), %v2240_v2  ;;  %p163_p3 = scmp.lt.s32.totalorder (!%p139_p2), %s2176_s18, 15  ;;  %v2242_v4 = vmov (!%p139_p2), 269488144   ;;  %vm1268_vm5 = vcmask (!%p139_p2), 1041408  }
   0x7   : > { %180 = vperm.xlu0 (!%p139_p2), %2226, %v175_v0   ;;  %288 = vperm.xlu1 (!%p139_p2), %2228, %v174_v1   ;;  %v183_v5 = vunpack.c.l.s4 (!%p139_p2), %v2242_v4  ;;  %v2281_v8 = vshrl.u32 (!%p139_p2), %v185_v6, 7  ;;  %vm1277_vm7 = vcmask (!%p139_p2), 1042432   ;;  %vm1286_vm9 = vcmask (!%p139_p2), 1043456   ;;  %s2856_s23 = sshll.u32 (!%p139_p2), %s2171_s13, 7 }
   0x8   : > { %vm1295_vm10 = vcmask (!%p139_p2), 1044480   ;;  %vm1304_vm11 = vcmask (!%p139_p2), 1045504   ;;  %vm1313_vm12 = vcmask (!%p139_p2), 1046528   ;;  %p169_p4 = scmp.lt.s32.totalorder (!%p139_p2), %s2856_s23, 255 }
   0x9   : > { %v184_v7 = vunpack.c.0.s8 (!%p139_p2), %v183_v5  ;;  %v2288_v22 = vsub.s32 (!%p139_p2), 0, %v2281_v8  ;;  %v2291_v23 = vsub.s32 (!%p139_p2), 1, %v2281_v8  ;;  %v220_v25 = vsub.s32 (!%p139_p2), 2, %v2281_v8 }
   0xa   : > { %v625_v26 = vsub.s32 (!%p139_p2), 3, %v2281_v8  ;;  %v224_v27 = vsub.s32 (!%p139_p2), 4, %v2281_v8  ;;  %v228_v28 = vsub.s32 (!%p139_p2), 6, %v2281_v8  ;;  %v629_v29 = vsub.s32 (!%p139_p2), 5, %v2281_v8 }
   0xb   : > { %2227 = vset.pattern.permute.xlu0 (!%p139_p2), %v2241_v3  ;;  %v187_v9 = vsub.s32 (!%p139_p2), %v184_v7, %v2281_v8  ;;  %v633_v31 = vsub.s32 (!%p139_p2), 7, %v2281_v8 }
   0xc   : > { %193 = vperm.xlu0 (!%p139_p2), %2227, %v175_v0  }
   0xd   : > { %s3587_s18 = smov (!%p163_p3, %s2176_s18), 15  ;;  %s3589_s23 = smov (!%p169_p4, %s2856_s23), 255 }
   0xe   : > { %s2177_s19 = sshll.u32 %s3587_s18, 1  ;;  %s2179_s24 = sshll.u32 %s3589_s23, 3 }
   0xf   : > { %s166_s22 = scalar_lea.vmem %s3532_s0, %s2177_s19  ;;  %s2928_s27 = scalar_lea.vmem %s3535_s3, %s2179_s24 }
  0x10   : > { %v177_v11 = vld [vmem:[%s166_s22 + $0x8] sm:$0xff]  ;;  %v176_v16 = vld [vmem:[%s166_s22] sm:$0xff] }
  0x86   : > { %v181_v10 = vpop.permute.xlu0 %180  ;;  %v2305_v36 = vpop.permute.xlu1 %288 }
  0x87   : > { %v188_v12 = vrot.slane %v181_v10, %v187_v9 }
  0x89   : > { %v191_v13 = vsub.f32 %v177_v11, %v188_v12  ;;  %v190_v17 = vsub.f32 %v176_v16, %v188_v12 }
  0x8b   : > { %v194_v14 = vpop.permute.xlu0 %193 }
  0x8c   : > { %v201_v15 = vrot.slane %v194_v14, %v187_v9 }
  0x8e   : > { %2230 = vrcp.f32 %v201_v15 }
  0x98   : > { %v2231_v18 = vpop.eup %2230 }
  0x99   : > { %v204_v19 = vmul.f32 %v2231_v18, %v190_v17  ;;  %v205_v20 = vmul.f32 %v2231_v18, %v191_v13 }
  0x9b   : > { %v206_v21 = vfloor.f32 %v204_v19  ;;  %v207_v44 = vfloor.f32 %v205_v20 }
  0x9d   : > { %v208_v24 = vmax.f32 %v206_v21, 0.0  ;;  %v209_v56 = vmax.f32 %v207_v44, 0.0 }
  0x9f   : > { %v210_v30 = vmin.f32 %v208_v24, 999.0  ;;  %v2342_v4 = vmin.f32 %v209_v56, 999.0 }
  0xa1   : > { %v221_v32 = vrot.slane %v210_v30, %v220_v25  ;;  %v217_v33 = vrot.slane %v210_v30, %v2288_v22  ;;  %v626_v34 = vrot.slane %v210_v30, %v625_v26  ;;  %v622_v35 = vrot.slane %v210_v30, %v2291_v23 }
  0xa2   : > { %v225_v37 = vrot.slane %v210_v30, %v224_v27  ;;  %v229_v38 = vrot.slane %v210_v30, %v228_v28  ;;  %v630_v39 = vrot.slane %v210_v30, %v629_v29  ;;  %v634_v46 = vrot.slane %v210_v30, %v633_v31 }
  0xa3   : > { %v261_v40 = vrot.slane %v221_v32, %v2288_v22  ;;  %v257_v41 = vrot.slane %v217_v33, %v2288_v22  ;;  %v666_v42 = vrot.slane %v626_v34, %v2291_v23  ;;  %v662_v43 = vrot.slane %v622_v35, %v2291_v23 }
  0xa4   : > { %v265_v45 = vrot.slane %v225_v37, %v2288_v22  ;;  %v269_v50 = vrot.slane %v229_v38, %v2288_v22  ;;  %v670_v51 = vrot.slane %v630_v39, %v2291_v23  ;;  %v674_v61 = vrot.slane %v634_v46, %v2291_v23 }
  0xa5   : > { %v292_v47 = vmul.f32 %v2305_v36, %v261_v40  ;;  %v291_v48 = vmul.f32 %v2305_v36, %v257_v41  ;;  %v2323_v49 = vmul.f32 %v666_v42, %v2305_v36  ;;  %v2329_v55 = vmul.f32 %v662_v43, %v2305_v36 }
  0xa6   : > { %v2332_v57 = vmul.f32 %v2305_v36, %v265_v45  ;;  %v2335_v60 = vmul.f32 %v2305_v36, %v269_v50  ;;  %v2339_v63 = vmul.f32 %v670_v51, %v2305_v36  ;;  %v2347_v10 = vmul.f32 %v674_v61, %v2305_v36 }
  0xa7   : > { %v300_v52 = vmul.f32 0.63661975, %v292_v47  ;;  %v299_v53 = vmul.f32 0.63661975, %v291_v48  ;;  %v700_v54 = vmul.f32 0.63661975, %v2323_v49 }
  0xa8   : > { %v699_v3 = vmul.f32 0.63661975, %v2329_v55  ;;  %v301_v5 = vmul.f32 0.63661975, %v2332_v57  ;;  %v302_v9 = vmul.f32 0.63661975, %v2335_v60 }
  0xa9   : > { %v308_v58 = vadd.f32 0.5, %v300_v52  ;;  %v307_v59 = vadd.f32 0.5, %v299_v53  ;;  %v708_v62 = vadd.f32 0.5, %v700_v54  ;;  %v2350_v14 = vmul.f32 0.63661975, %v2339_v63 }
  0xaa   : > { %v707_v18 = vadd.f32 0.5, %v699_v3  ;;  %v309_v24 = vadd.f32 0.5, %v301_v5  ;;  %v2354_v33 = vadd.f32 0.5, %v302_v9  ;;  %v2357_v34 = vmul.f32 0.63661975, %v2347_v10 }
  0xab   : > { %v316_v0 = vfloor.f32 %v308_v58  ;;  %v315_v1 = vfloor.f32 %v307_v59  ;;  %v716_v13 = vfloor.f32 %v708_v62 }
  0xac   : > { %v2362_v43 = vfloor.f32 %v707_v18 }
  0xad   : > { %v324_v6 = vmul.f32 1.5703125, %v316_v0  ;;  %v2184_v7 = vtrunc.f32 %v316_v0  ;;  %v323_v11 = vmul.f32 1.5703125, %v315_v1  ;;  %v2182_v12 = vtrunc.f32 %v315_v1 }
  0xae   : > { %v340_v16 = vmul.f32 0.0004837513, %v316_v0  ;;  %v339_v20 = vmul.f32 0.0004837513, %v315_v1  ;;  %v356_v32 = vmul.f32 7.54979e-08, %v316_v0  ;;  %v355_v38 = vmul.f32 7.54979e-08, %v315_v1 }
  0xaf   : > { %v332_v15 = vsub.f32 %v292_v47, %v324_v6  ;;  %v2185_v17 = vcvt.f32.s32 %v2184_v7  ;;  %v331_v19 = vsub.f32 %v291_v48, %v323_v11  ;;  %v2352_v21 = vcvt.f32.s32 %v2182_v12 }
  0xb0   : > { %v724_v39 = vmul.f32 1.5703125, %v716_v13  ;;  %v2200_v42 = vtrunc.f32 %v716_v13  ;;  %v740_v45 = vmul.f32 0.0004837513, %v716_v13  ;;  %v756_v46 = vmul.f32 7.54979e-08, %v716_v13 }
  0xb1   : > { %v348_v30 = vsub.f32 %v332_v15, %v340_v16  ;;  %v580_v35 = vadd.s32 1, %v2185_v17  ;;  %v347_v37 = vsub.f32 %v331_v19, %v339_v20  ;;  %v579_v41 = vadd.s32 1, %v2352_v21 }
  0xb2   : > { %v2366_v47 = vfloor.f32 %v309_v24  ;;  %v516_v50 = vand.u32 1, %v2185_v17  ;;  %v548_v51 = vand.u32 2, %v2185_v17  ;;  %v515_v52 = vand.u32 1, %v2352_v21 }
  0xb3   : > { %v2359_v40 = vsub.f32 %v348_v30, %v356_v32  ;;  %v2364_v44 = vsub.f32 %v347_v37, %v355_v38  ;;  %v588_v53 = vand.u32 2, %v580_v35  ;;  %v547_v56 = vand.u32 2, %v2352_v21 }
  0xb4   : > { %v732_v58 = vsub.f32 %v2323_v49, %v724_v39  ;;  %v587_v62 = vand.u32 2, %v579_v41  ;;  %v2375_v0 = vcvt.f32.s32 %v2200_v42  ;;  %v2378_v6 = vmul.f32 1.5703125, %v2362_v43 }
  0xb5   : > { %v380_v48 = vmul.f32 %v2359_v40, %v2359_v40  ;;  %v379_v54 = vmul.f32 %v2364_v44, %v2364_v44  ;;  %v2382_v12 = vmul.f32 0.0004837513, %v2362_v43  ;;  %vm2384_vm0 = vcmp.eq.s32.totalorder %v516_v50, 1 }
  0xb6   : > { %v748_v17 = vsub.f32 %v732_v58, %v740_v45  ;;  %vm2389_vm1 = vcmp.eq.s32.totalorder %v515_v52, 1  ;;  %vm2395_vm2 = vcmp.eq.s32.totalorder %v548_v51, 2  ;;  %vm2399_vm3 = vcmp.eq.s32.totalorder %v588_v53, 2 }
  0xb7   : > { %v388_v59 = vmul.f32 -0.00019515296, %v380_v48  ;;  %v444_v61 = vmul.f32 2.4433157e-05, %v380_v48  ;;  %v476_v1 = vmul.f32 0.5, %v380_v48  ;;  %v420_v9 = vmul.f32 %v380_v48, %v2359_v40 }
  0xb8   : > { %v387_v3 = vmul.f32 -0.00019515296, %v379_v54  ;;  %v443_v5 = vmul.f32 2.4433157e-05, %v379_v54  ;;  %v475_v16 = vmul.f32 0.5, %v379_v54  ;;  %v492_v20 = vmul.f32 %v380_v48, %v380_v48 }
  0xb9   : > { %v396_v7 = vadd.f32 0.008332161, %v388_v59  ;;  %v452_v11 = vadd.f32 -0.0013887316, %v444_v61  ;;  %v419_v21 = vmul.f32 %v379_v54, %v2364_v44  ;;  %v484_v30 = vsub.f32 1.0, %v476_v1 }
  0xba   : > { %v395_v13 = vadd.f32 0.008332161, %v387_v3  ;;  %v451_v15 = vadd.f32 -0.0013887316, %v443_v5  ;;  %v2393_v37 = vsub.f32 %v748_v17, %v756_v46  ;;  %v491_v45 = vmul.f32 %v379_v54, %v379_v54 }
  0xbb   : > { %v404_v18 = vmul.f32 %v396_v7, %v380_v48  ;;  %v460_v19 = vmul.f32 %v452_v11, %v380_v48  ;;  %v2404_v48 = vadd.s32 1, %v2375_v0  ;;  %v483_v58 = vsub.f32 1.0, %v475_v16 }
  0xbc   : > { %v403_v32 = vmul.f32 %v395_v13, %v379_v54  ;;  %v459_v35 = vmul.f32 %v451_v15, %v379_v54  ;;  %v780_v46 = vmul.f32 %v2393_v37, %v2393_v37  ;;  %vm2408_vm6 = vcmp.eq.s32.totalorder %v547_v56, 2 }
  0xbd   : > { %v412_v38 = vadd.f32 -0.16666655, %v404_v18  ;;  %v468_v39 = vadd.f32 0.041666646, %v460_v19  ;;  %v916_v53 = vand.u32 1, %v2375_v0  ;;  %v948_v54 = vand.u32 2, %v2375_v0 }
  0xbe   : > { %v411_v50 = vadd.f32 -0.16666655, %v403_v32  ;;  %v467_v52 = vadd.f32 0.041666646, %v459_v35  ;;  %vm2414_vm8 = vcmp.eq.s32.totalorder %v587_v62, 2  ;;  %v2420_v15 = vmul.f32 0.5, %v780_v46 }
  0xbf   : > { %v428_v59 = vmul.f32 %v420_v9, %v412_v38  ;;  %v500_v51 = vmul.f32 %v492_v20, %v468_v39  ;;  %v788_v7 = vmul.f32 -0.00019515296, %v780_v46  ;;  %v988_v9 = vand.u32 2, %v2404_v48 }
  0xc0   : > { %v427_v1 = vmul.f32 %v419_v21, %v411_v50  ;;  %v499_v3 = vmul.f32 %v491_v45, %v467_v52  ;;  %v844_v13 = vmul.f32 2.4433157e-05, %v780_v46  ;;  %v731_v62 = vsub.f32 %v2329_v55, %v2378_v6 }
  0xc1   : > { %v436_v11 = vadd.f32 %v428_v59, %v2359_v40  ;;  %v508_v56 = vadd.f32 %v500_v51, %v484_v30  ;;  %v796_v18 = vadd.f32 0.008332161, %v788_v7  ;;  %v2430_v40 = vmul.f32 %v780_v46, %v2393_v37 }
  0xc2   : > { %v435_v16 = vadd.f32 %v427_v1, %v2364_v44  ;;  %v507_v17 = vadd.f32 %v499_v3, %v483_v58  ;;  %v852_v21 = vadd.f32 -0.0013887316, %v844_v13  ;;  %v884_v38 = vsub.f32 1.0, %v2420_v15 }
  0xc3   : > { %v532_v19 = vsel %vm2384_vm0, %v508_v56, %v436_v11  ;;  %v540_v20 = vsel %vm2384_vm0, %v436_v11, %v508_v56  ;;  %v2437_v49 = vmul.f32 %v780_v46, %v780_v46  ;;  %v804_v50 = vmul.f32 %v796_v18, %v780_v46 }
  0xc4   : > { %v564_v30 = vsub.f32 0.0, %v532_v19  ;;  %v604_v32 = vsub.f32 0.0, %v540_v20  ;;  %v531_v44 = vsel %vm2389_vm1, %v507_v17, %v435_v16  ;;  %v539_v55 = vsel %vm2389_vm1, %v435_v16, %v507_v17 }
  0xc5   : > { %v563_v6 = vsub.f32 0.0, %v531_v44  ;;  %v603_v35 = vsub.f32 0.0, %v539_v55  ;;  %v860_v52 = vmul.f32 %v852_v21, %v780_v46  ;;  %v2444_v24 = vsub.f32 %v731_v62, %v2382_v12 }
  0xc6   : > { %v572_v39 = vsel %vm2395_vm2, %v564_v30, %v532_v19  ;;  %v612_v45 = vsel %vm2399_vm3, %v604_v32, %v540_v20  ;;  %vm924_vm13 = vcmp.eq.s32.totalorder %v916_v53, 1  ;;  %vm956_vm14 = vcmp.eq.s32.totalorder %v948_v54, 2 }
  0xc7   : > { %v1028_v58 = vrot.slane %v612_v45, 7  ;;  %v1052_v59 = vrot.slane %v572_v39, 7  ;;  %v1068_v51 = vrot.slane %v612_v45, 6  ;;  %v1084_v1 = vrot.slane %v572_v39, 6 }
  0xc8   : > { %v1100_v3 = vrot.slane %v612_v45, 5  ;;  %v1116_v7 = vrot.slane %v572_v39, 5  ;;  %v2448_v11 = vsel %vm2408_vm6, %v563_v6, %v531_v44  ;;  %v1132_v41 = vrot.slane %v612_v45, 4 }
  0xc9   : > { %v1261_v56 = vsel %vm1259_vm4, %v572_v39, %v1028_v58  ;;  %v2453_v42 = vsel %vm2414_vm8, %v603_v35, %v539_v55  ;;  %v1051_v46 = vrot.slane %v2448_v11, 7  ;;  %v1083_v17 = vrot.slane %v2448_v11, 6 }
  0xca   : > { %v1270_v13 = vsel %vm1268_vm5, %v1261_v56, %v1052_v59  ;;  %v1027_v12 = vrot.slane %v2453_v42, 7  ;;  %v1067_v16 = vrot.slane %v2453_v42, 6  ;;  %v1099_v18 = vrot.slane %v2453_v42, 5 }
  0xcb   : > { %v1279_v61 = vsel %vm1277_vm7, %v1270_v13, %v1068_v51  ;;  %v1115_v62 = vrot.slane %v2448_v11, 5  ;;  %v1148_v19 = vrot.slane %v572_v39, 4  ;;  %v1164_v21 = vrot.slane %v612_v45, 3 }
  0xcc   : > { %v1288_v5 = vsel %vm1286_vm9, %v1279_v61, %v1084_v1  ;;  %v1260_v20 = vsel %vm1259_vm4, %v2448_v11, %v1027_v12  ;;  %v1180_v30 = vrot.slane %v572_v39, 3  ;;  %v1131_v44 = vrot.slane %v2453_v42, 4 }
  0xcd   : > { %v1297_v32 = vsel %vm1295_vm10, %v1288_v5, %v1100_v3  ;;  %v1269_v55 = vsel %vm1268_vm5, %v1260_v20, %v1051_v46  ;;  %v1196_v6 = vrot.slane %v612_v45, 2  ;;  %v1212_v59 = vrot.slane %v572_v39, 2 }
  0xce   : > { %v1306_v35 = vsel %vm1304_vm11, %v1297_v32, %v1116_v7  ;;  %v1278_v58 = vsel %vm1277_vm7, %v1269_v55, %v1067_v16  ;;  %v1228_v51 = vrot.slane %v612_v45, 1  ;;  %v1323_v13 = vsel %vm1259_vm4, %v1148_v19, %v1164_v21 }
  0xcf   : > { %v1315_v1 = vsel %vm1313_vm12, %v1306_v35, %v1132_v41  ;;  %v1287_v56 = vsel %vm1286_vm9, %v1278_v58, %v1083_v17  ;;  %v1147_v12 = vrot.slane %v2448_v11, 4  ;;  %v1331_v46 = vsel %vm1268_vm5, %v1323_v13, %v1180_v30 }
  0xd0   : > { %1762 = vxpose.xlu0.b32.start [1/4] (short) %v1315_v1, 128  ;;  %v1296_v3 = vsel %vm1295_vm10, %v1287_v56, %v1099_v18  ;;  %v1163_v61 = vrot.slane %v2453_v42, 3  ;;  %v1179_v7 = vrot.slane %v2448_v11, 3  ;;  %v1244_v5 = vrot.slane %v572_v39, 1 }
  0xd1   : > { %v1305_v16 = vsel %vm1304_vm11, %v1296_v3, %v1115_v62  ;;  %v1339_v41 = vsel %vm1277_vm7, %v1331_v46, %v1196_v6  ;;  %v1195_v17 = vrot.slane %v2453_v42, 2  ;;  %v1211_v21 = vrot.slane %v2448_v11, 2 }
  0xd2   : > { %v1314_v19 = vsel %vm1313_vm12, %v1305_v16, %v1131_v44  ;;  %v1347_v20 = vsel %vm1286_vm9, %v1339_v41, %v1212_v59  ;;  %v1227_v18 = vrot.slane %v2453_v42, 1  ;;  %v1322_v32 = vsel %vm1259_vm4, %v1147_v12, %v1163_v61 }
  0xd3   : > { %1730 = vxpose.xlu1.b32.start [1/4] (short) %v1314_v19, 128  ;;  %v1355_v30 = vsel %vm1295_vm10, %v1347_v20, %v1228_v51  ;;  %v812_v55 = vadd.f32 -0.16666655, %v804_v50  ;;  %v868_v62 = vadd.f32 0.041666646, %v860_v52  ;;  %v1330_v6 = vsel %vm1268_vm5, %v1322_v32, %v1179_v7 }
  0xd4   : > { %v1363_v39 = vsel %vm1304_vm11, %v1355_v30, %v1244_v5  ;;  %v755_v35 = vmul.f32 7.54979e-08, %v2362_v43  ;;  %v2198_v44 = vtrunc.f32 %v2362_v43  ;;  %v1338_v59 = vsel %vm1277_vm7, %v1330_v6, %v1195_v17 }
  0xd5   : > { %v1371_v58 = vsel %vm1313_vm12, %v1363_v39, %v612_v45  ;;  %v828_v1 = vmul.f32 %v2430_v40, %v812_v55  ;;  %v900_v51 = vmul.f32 %v2437_v49, %v868_v62  ;;  %v1243_v50 = vrot.slane %v2448_v11, 1 }
  0xd6   : > { %1763 = vxpose.xlu0.b32.cont [2/4] (short) %v1371_v58, 128  ;;  %v1346_v52 = vsel %vm1286_vm9, %v1338_v59, %v1211_v21  ;;  %v763_v56 = vsub.f32 %v2444_v24, %v755_v35  ;;  %v2500_v13 = vfloor.f32 %v2354_v33  ;;  %v2506_v40 = vcvt.f32.s32 %v2198_v44 }
  0xd7   : > { %v1354_v43 = vsel %vm1295_vm10, %v1346_v52, %v1227_v18  ;;  %v836_v45 = vadd.f32 %v828_v1, %v2393_v37  ;;  %v908_v12 = vadd.f32 %v900_v51, %v884_v38  ;;  %vm996_vm15 = vcmp.eq.s32.totalorder %v988_v9, 2 }
  0xd8   : > { %v1362_v49 = vsel %vm1304_vm11, %v1354_v43, %v1243_v50  ;;  %v779_v24 = vmul.f32 %v763_v56, %v763_v56  ;;  %v325_v46 = vmul.f32 1.5703125, %v2366_v47  ;;  %v915_v53 = vand.u32 1, %v2506_v40 }
  0xd9   : > { %v1370_v33 = vsel %vm1313_vm12, %v1362_v49, %v2453_v42  ;;  %v932_v11 = vsel %vm924_vm13, %v908_v12, %v836_v45  ;;  %v940_v3 = vsel %vm924_vm13, %v836_v45, %v908_v12  ;;  %v947_v0 = vand.u32 2, %v2506_v40 }
  0xda   : > { %1731 = vxpose.xlu1.b32.cont [2/4] (short) %v1370_v33, 128  ;;  %v964_v37 = vsub.f32 0.0, %v932_v11  ;;  %v1004_v15 = vsub.f32 0.0, %v940_v3  ;;  %v787_v38 = vmul.f32 -0.00019515296, %v779_v24  ;;  %v843_v61 = vmul.f32 2.4433157e-05, %v779_v24 }
  0xdb   : > { %v341_v54 = vmul.f32 0.0004837513, %v2366_v47  ;;  %v979_v5 = vadd.s32 1, %v2506_v40  ;;  %v819_v41 = vmul.f32 %v779_v24, %v763_v56  ;;  %v875_v17 = vmul.f32 0.5, %v779_v24 }
  0xdc   : > { %v972_v7 = vsel %vm956_vm14, %v964_v37, %v932_v11  ;;  %v1012_v42 = vsel %vm996_vm15, %v1004_v15, %v940_v3  ;;  %v795_v16 = vadd.f32 0.008332161, %v787_v38  ;;  %v891_v18 = vmul.f32 %v779_v24, %v779_v24 }
  0xdd   : > { %v1387_v48 = vrot.slane %v1012_v42, 7  ;;  %v1411_v9 = vrot.slane %v972_v7, 7  ;;  %v1427_v19 = vrot.slane %v1012_v42, 6  ;;  %v1443_v20 = vrot.slane %v972_v7, 6 }
  0xde   : > { %v803_v21 = vmul.f32 %v795_v16, %v779_v24  ;;  %v1459_v30 = vrot.slane %v1012_v42, 5  ;;  %v1475_v32 = vrot.slane %v972_v7, 5  ;;  %v851_v62 = vadd.f32 -0.0013887316, %v843_v61 }
  0xdf   : > { %v1619_v55 = vsel %vm1259_vm4, %v972_v7, %v1387_v48  ;;  %v1507_v35 = vrot.slane %v972_v7, 4  ;;  %v1523_v44 = vrot.slane %v1012_v42, 3  ;;  %v1491_v58 = vrot.slane %v1012_v42, 4 }
  0xe0   : > { %v1627_v39 = vsel %vm1268_vm5, %v1619_v55, %v1411_v9  ;;  %v811_v6 = vadd.f32 -0.16666655, %v803_v21  ;;  %v859_v1 = vmul.f32 %v851_v62, %v779_v24  ;;  %v1539_v51 = vrot.slane %v972_v7, 3 }
  0xe1   : > { %v1635_v59 = vsel %vm1277_vm7, %v1627_v39, %v1427_v19  ;;  %v883_v43 = vsub.f32 1.0, %v875_v17  ;;  %v1555_v45 = vrot.slane %v1012_v42, 2  ;;  %v1571_v33 = vrot.slane %v972_v7, 2 }
  0xe2   : > { %v1643_v50 = vsel %vm1286_vm9, %v1635_v59, %v1443_v20  ;;  %v827_v52 = vmul.f32 %v819_v41, %v811_v6  ;;  %v867_v49 = vadd.f32 0.041666646, %v859_v1  ;;  %v1587_v11 = vrot.slane %v1012_v42, 1 }
  0xe3   : > { %v1651_v12 = vsel %vm1295_vm10, %v1643_v50, %v1459_v30  ;;  %v1675_v15 = vsel %vm1259_vm4, %v1507_v35, %v1523_v44  ;;  %v333_v38 = vsub.f32 %v2332_v57, %v325_v46  ;;  %v357_v48 = vmul.f32 7.54979e-08, %v2366_v47 }
  0xe4   : > { %v1659_v3 = vsel %vm1304_vm11, %v1651_v12, %v1475_v32  ;;  %v835_v37 = vadd.f32 %v827_v52, %v763_v56  ;;  %v899_v61 = vmul.f32 %v891_v18, %v867_v49  ;;  %v1683_v16 = vsel %vm1268_vm5, %v1675_v15, %v1539_v51 }
  0xe5   : > { %v1667_v24 = vsel %vm1313_vm12, %v1659_v3, %v1491_v58  ;;  %v1691_v9 = vsel %vm1277_vm7, %v1683_v16, %v1555_v45  ;;  %v349_v41 = vsub.f32 %v333_v38, %v341_v54  ;;  %v2186_v17 = vtrunc.f32 %v2366_v47 }
  0xe6   : > { %1764 = vxpose.xlu0.b32.cont [3/4] (short) %v1667_v24, 128  ;;  %v326_v19 = vmul.f32 1.5703125, %v2500_v13  ;;  %v907_v56 = vadd.f32 %v899_v61, %v883_v43  ;;  %v987_v20 = vand.u32 2, %v979_v5  ;;  %v1603_v21 = vrot.slane %v972_v7, 1 }
  0xe7   : > { %v1699_v57 = vsel %vm1286_vm9, %v1691_v9, %v1571_v33  ;;  %vm923_vm0 = vcmp.eq.s32.totalorder %v915_v53, 1  ;;  %v2538_v18 = vsub.f32 %v349_v41, %v357_v48  ;;  %v2540_v30 = vcvt.f32.s32 %v2186_v17 }
  0xe8   : > { %v1707_v46 = vsel %vm1295_vm10, %v1699_v57, %v1587_v11  ;;  %v931_v32 = vsel %vm923_vm0, %v907_v56, %v835_v37  ;;  %v939_v55 = vsel %vm923_vm0, %v835_v37, %v907_v56  ;;  %v334_v47 = vsub.f32 %v2335_v60, %v326_v19 }
  0xe9   : > { %v1715_v54 = vsel %vm1304_vm11, %v1707_v46, %v1603_v21  ;;  %v963_v62 = vsub.f32 0.0, %v931_v32  ;;  %v1003_v39 = vsub.f32 0.0, %v939_v55  ;;  %v381_v7 = vmul.f32 %v2538_v18, %v2538_v18 }
  0xea   : > { %v1723_v5 = vsel %vm1313_vm12, %v1715_v54, %v1012_v42  ;;  %vm955_vm1 = vcmp.eq.s32.totalorder %v947_v0, 2  ;;  %vm995_vm2 = vcmp.eq.s32.totalorder %v987_v20, 2  ;;  %v342_v53 = vmul.f32 0.0004837513, %v2500_v13 }
  0xeb   : > { %1765 = vxpose.xlu0.b32.end [4/4] (short) %v1723_v5, 128  ;;  %v358_v6 = vmul.f32 7.54979e-08, %v2500_v13  ;;  %v971_v35 = vsel %vm955_vm1, %v963_v62, %v931_v32  ;;  %v1011_v44 = vsel %vm995_vm2, %v1003_v39, %v939_v55  ;;  %v2552_v60 = vadd.s32 1, %v2540_v30 }
  0xec   : > { %v2188_v58 = vtrunc.f32 %v2500_v13  ;;  %v1386_v42 = vrot.slane %v1011_v44, 7  ;;  %v1410_v59 = vrot.slane %v971_v35, 7  ;;  %v389_v1 = vmul.f32 -0.00019515296, %v381_v7 }
  0xed   : > { %v350_v51 = vsub.f32 %v334_v47, %v342_v53  ;;  %v1426_v50 = vrot.slane %v1011_v44, 6  ;;  %v1442_v40 = vrot.slane %v971_v35, 6  ;;  %v1506_v0 = vrot.slane %v971_v35, 4 }
  0xee   : > { %v421_v52 = vmul.f32 %v381_v7, %v2538_v18  ;;  %v1458_v43 = vrot.slane %v1011_v44, 5  ;;  %v1618_v45 = vsel %vm1259_vm4, %v971_v35, %v1386_v42  ;;  %v1522_v12 = vrot.slane %v1011_v44, 3 }
  0xef   : > { %v1538_v49 = vrot.slane %v971_v35, 3  ;;  %v1474_v33 = vrot.slane %v971_v35, 5  ;;  %v1490_v11 = vrot.slane %v1011_v44, 4  ;;  %v1626_v3 = vsel %vm1268_vm5, %v1618_v45, %v1410_v59 }
  0xf0   : > { %v1554_v37 = vrot.slane %v1011_v44, 2  ;;  %v1634_v13 = vsel %vm1277_vm7, %v1626_v3, %v1426_v50  ;;  %v1674_v15 = vsel %vm1259_vm4, %v1506_v0, %v1522_v12  ;;  %v397_v38 = vadd.f32 0.008332161, %v389_v1 }
  0xf1   : > { %v445_v24 = vmul.f32 2.4433157e-05, %v381_v7  ;;  %v1642_v61 = vsel %vm1286_vm9, %v1634_v13, %v1442_v40  ;;  %v1570_v16 = vrot.slane %v971_v35, 2  ;;  %v1586_v48 = vrot.slane %v1011_v44, 1 }
  0xf2   : > { %v1682_v9 = vsel %vm1268_vm5, %v1674_v15, %v1538_v49  ;;  %v1650_v41 = vsel %vm1295_vm10, %v1642_v61, %v1458_v43  ;;  %v405_v19 = vmul.f32 %v397_v38, %v381_v7  ;;  %v1602_v21 = vrot.slane %v971_v35, 1 }
  0xf3   : > { %v1690_v17 = vsel %vm1277_vm7, %v1682_v9, %v1554_v37  ;;  %v453_v56 = vadd.f32 -0.0013887316, %v445_v24  ;;  %v1658_v20 = vsel %vm1304_vm11, %v1650_v41, %v1474_v33  ;;  %v477_v46 = vmul.f32 0.5, %v381_v7 }
  0xf4   : > { %v1698_v57 = vsel %vm1286_vm9, %v1690_v17, %v1570_v16  ;;  %v1666_v32 = vsel %vm1313_vm12, %v1658_v20, %v1490_v11  ;;  %v413_v54 = vadd.f32 -0.16666655, %v405_v19  ;;  %v517_v39 = vand.u32 1, %v2540_v30 }
  0xf5   : > { %v1706_v55 = vsel %vm1295_vm10, %v1698_v57, %v1586_v48  ;;  %v461_v47 = vmul.f32 %v453_v56, %v381_v7  ;;  %1732 = vxpose.xlu1.b32.cont [3/4] (short) %v1666_v32, 128  ;;  %v549_v5 = vand.u32 2, %v2540_v30  ;;  %v366_v53 = vsub.f32 %v350_v51, %v358_v6 }
  0xf6   : > { %v1714_v62 = vsel %vm1304_vm11, %v1706_v55, %v1602_v21  ;;  %v429_v42 = vmul.f32 %v421_v52, %v413_v54  ;;  %v493_v35 = vmul.f32 %v381_v7, %v381_v7  ;;  %v2189_v1 = vcvt.f32.s32 %v2188_v58 }
  0xf7   : > { %v469_v59 = vadd.f32 0.041666646, %v461_v47  ;;  %v589_v50 = vand.u32 2, %v2552_v60  ;;  %v382_v40 = vmul.f32 %v366_v53, %v366_v53  ;;  %v709_v0 = vadd.f32 0.5, %v2350_v14 }
  0xf8   : > { %v233_v43 = vrot.slane %v2342_v4, %v2288_v22  ;;  %v1722_v45 = vsel %vm1313_vm12, %v1714_v62, %v1011_v44  ;;  %v437_v12 = vadd.f32 %v429_v42, %v2538_v18  ;;  %v485_v49 = vsub.f32 1.0, %v477_v46 }
  0xf9   : > { %v501_v33 = vmul.f32 %v493_v35, %v469_v59  ;;  %1733 = vxpose.xlu1.b32.end [4/4] (short) %v1722_v45, 128  ;;  %v390_v30 = vmul.f32 -0.00019515296, %v382_v40  ;;  %v446_v6 = vmul.f32 2.4433157e-05, %v382_v40  ;;  %v710_v7 = vadd.f32 0.5, %v2357_v34 }
  0xfa   : > { %v2581_v60 = vrot.slane %v2342_v4, %v220_v25  ;;  %vm525_vm3 = vcmp.eq.s32.totalorder %v517_v39, 1  ;;  %vm2583_vm6 = vcmp.eq.s32.totalorder %v549_v5, 2  ;;  %v518_v44 = vand.u32 1, %v2189_v1 }
  0xfb   : > { %v509_v14 = vadd.f32 %v501_v33, %v485_v49  ;;  %vm2587_vm8 = vcmp.eq.s32.totalorder %v589_v50, 2  ;;  %v398_v51 = vadd.f32 0.008332161, %v390_v30  ;;  %v454_v52 = vadd.f32 -0.0013887316, %v446_v6 }
  0xfc   : > { %v2591_v11 = vfloor.f32 %v709_v0  ;;  %v478_v37 = vmul.f32 0.5, %v382_v40  ;;  %v550_v25 = vand.u32 2, %v2189_v1  ;;  %v422_v61 = vmul.f32 %v382_v40, %v366_v53 }
  0xfd   : > { %v533_v34 = vsel %vm525_vm3, %v509_v14, %v437_v12  ;;  %v541_v3 = vsel %vm525_vm3, %v437_v12, %v509_v14  ;;  %v406_v38 = vmul.f32 %v398_v51, %v382_v40  ;;  %v462_v24 = vmul.f32 %v454_v52, %v382_v40 }
  0xfe   : > { %v565_v13 = vsub.f32 0.0, %v533_v34  ;;  %v605_v15 = vsub.f32 0.0, %v541_v3  ;;  %v494_v16 = vmul.f32 %v382_v40, %v382_v40  ;;  %vm2593_vm13 = vcmp.eq.s32.totalorder %v518_v44, 1 }
  0xff   : > { %v2597_v9 = vfloor.f32 %v710_v7  ;;  %v414_v19 = vadd.f32 -0.16666655, %v406_v38  ;;  %v470_v56 = vadd.f32 0.041666646, %v462_v24  ;;  %vm2609_vm14 = vcmp.eq.s32.totalorder %v550_v25, 2 }
 0x100   : > { %v2601_v41 = vsel %vm2583_vm6, %v565_v13, %v533_v34  ;;  %v2605_v17 = vsel %vm2587_vm8, %v605_v15, %v541_v3  ;;  %v582_v46 = vadd.s32 1, %v2189_v1  ;;  %v486_v54 = vsub.f32 1.0, %v478_v37 }
 0x101   : > { %v1029_v20 = vrot.slane %v2605_v17, 7  ;;  %v1053_v21 = vrot.slane %v2601_v41, 7  ;;  %v1069_v32 = vrot.slane %v2605_v17, 6  ;;  %v430_v55 = vmul.f32 %v422_v61, %v414_v19 }
 0x102   : > { %v725_v47 = vmul.f32 1.5703125, %v2591_v11  ;;  %v1085_v62 = vrot.slane %v2601_v41, 6  ;;  %v502_v5 = vmul.f32 %v494_v16, %v470_v56  ;;  %v1149_v42 = vrot.slane %v2601_v41, 4 }
 0x103   : > { %v1262_v39 = vsel %vm1259_vm4, %v2601_v41, %v1029_v20  ;;  %v438_v35 = vadd.f32 %v430_v55, %v366_v53  ;;  %v1165_v50 = vrot.slane %v2605_v17, 3  ;;  %v1181_v1 = vrot.slane %v2601_v41, 3 }
 0x104   : > { %v1271_v59 = vsel %vm1268_vm5, %v1262_v39, %v1053_v21  ;;  %v510_v0 = vadd.f32 %v502_v5, %v486_v54  ;;  %v590_v45 = vand.u32 2, %v582_v46  ;;  %v741_v12 = vmul.f32 0.0004837513, %v2591_v11 }
 0x105   : > { %v1280_v40 = vsel %vm1277_vm7, %v1271_v59, %v1069_v32  ;;  %v1197_v33 = vrot.slane %v2605_v17, 2  ;;  %v1324_v30 = vsel %vm1259_vm4, %v1149_v42, %v1165_v50  ;;  %v733_v6 = vsub.f32 %v2339_v63, %v725_v47 }
 0x106   : > { %v1289_v49 = vsel %vm1286_vm9, %v1280_v40, %v1085_v62  ;;  %v1101_v53 = vrot.slane %v2605_v17, 5  ;;  %v534_v7 = vsel %vm2593_vm13, %v510_v0, %v438_v35  ;;  %v542_v14 = vsel %vm2593_vm13, %v438_v35, %v510_v0 }
 0x107   : > { %v1332_v58 = vsel %vm1268_vm5, %v1324_v30, %v1181_v1  ;;  %v566_v44 = vsub.f32 0.0, %v534_v7  ;;  %v606_v18 = vsub.f32 0.0, %v542_v14  ;;  %v2202_v52 = vtrunc.f32 %v2591_v11 }
 0x108   : > { %v1340_v51 = vsel %vm1277_vm7, %v1332_v58, %v1197_v33  ;;  %v1298_v34 = vsel %vm1295_vm10, %v1289_v49, %v1101_v53  ;;  %vm598_vm15 = vcmp.eq.s32.totalorder %v590_v45, 2  ;;  %v1213_v63 = vrot.slane %v2601_v41, 2 }
 0x109   : > { %v757_v3 = vmul.f32 7.54979e-08, %v2591_v11  ;;  %v1117_v37 = vrot.slane %v2601_v41, 5  ;;  %v1133_v25 = vrot.slane %v2605_v17, 4  ;;  %v574_v13 = vsel %vm2609_vm14, %v566_v44, %v534_v7 }
 0x10a   : > { %v2643_v15 = vsel %vm598_vm15, %v606_v18, %v542_v14  ;;  %v1054_v24 = vrot.slane %v574_v13, 7  ;;  %v1229_v61 = vrot.slane %v2605_v17, 1  ;;  %v1348_v16 = vsel %vm1286_vm9, %v1340_v51, %v1213_v63 }
 0x10b   : > { %v1030_v38 = vrot.slane %v2643_v15, 7  ;;  %v1307_v48 = vsel %vm1304_vm11, %v1298_v34, %v1117_v37  ;;  %v1245_v11 = vrot.slane %v2601_v41, 1  ;;  %v749_v19 = vsub.f32 %v733_v6, %v741_v12 }
 0x10c   : > { %v2203_v56 = vcvt.f32.s32 %v2202_v52  ;;  %v1070_v20 = vrot.slane %v2643_v15, 6  ;;  %v1150_v57 = vrot.slane %v574_v13, 4  ;;  %v1166_v46 = vrot.slane %v2643_v15, 3 }
 0x10d   : > { %v1263_v21 = vsel %vm1259_vm4, %v574_v13, %v1030_v38  ;;  %v1086_v32 = vrot.slane %v574_v13, 6  ;;  %v1356_v54 = vsel %vm1295_vm10, %v1348_v16, %v1229_v61  ;;  %v1182_v47 = vrot.slane %v574_v13, 3 }
 0x10e   : > { %v1272_v55 = vsel %vm1268_vm5, %v1263_v21, %v1054_v24  ;;  %v1102_v62 = vrot.slane %v2643_v15, 5  ;;  %v1198_v41 = vrot.slane %v2643_v15, 2  ;;  %v1325_v5 = vsel %vm1259_vm4, %v1150_v57, %v1166_v46 }
 0x10f   : > { %v1281_v39 = vsel %vm1277_vm7, %v1272_v55, %v1070_v20  ;;  %v1214_v59 = vrot.slane %v574_v13, 2  ;;  %v1333_v35 = vsel %vm1268_vm5, %v1325_v5, %v1182_v47  ;;  %v765_v50 = vsub.f32 %v749_v19, %v757_v3 }
 0x110   : > { %v1290_v42 = vsel %vm1286_vm9, %v1281_v39, %v1086_v32  ;;  %v1316_v1 = vsel %vm1313_vm12, %v1307_v48, %v1133_v25  ;;  %v1364_v40 = vsel %vm1304_vm11, %v1356_v54, %v1245_v11  ;;  %v1341_v0 = vsel %vm1277_vm7, %v1333_v35, %v1198_v41 }
 0x111   : > { %v981_v45 = vadd.s32 1, %v2203_v56  ;;  %v1299_v12 = vsel %vm1295_vm10, %v1290_v42, %v1102_v62  ;;  %v1349_v49 = vsel %vm1286_vm9, %v1341_v0, %v1214_v59  ;;  %v781_v33 = vmul.f32 %v765_v50, %v765_v50 }
 0x112   : > { %v726_v30 = vmul.f32 1.5703125, %v2597_v9  ;;  %v1118_v6 = vrot.slane %v574_v13, 5  ;;  %v1134_v53 = vrot.slane %v2643_v15, 4  ;;  %v1230_v7 = vrot.slane %v2643_v15, 1 }
 0x113   : > { %v917_v14 = vand.u32 1, %v2203_v56  ;;  %v1372_v58 = vsel %vm1313_vm12, %v1364_v40, %v2605_v17  ;;  %v1246_v44 = vrot.slane %v574_v13, 1  ;;  %v789_v18 = vmul.f32 -0.00019515296, %v781_v33 }
 0x114   : > { %v845_v51 = vmul.f32 2.4433157e-05, %v781_v33  ;;  %v1308_v52 = vsel %vm1304_vm11, %v1299_v12, %v1118_v6  ;;  %v1357_v34 = vsel %vm1295_vm10, %v1349_v49, %v1230_v7  ;;  %v949_v63 = vand.u32 2, %v2203_v56 }
 0x115   : > { %v989_v3 = vand.u32 2, %v981_v45  ;;  %v797_v37 = vadd.f32 0.008332161, %v789_v18  ;;  %v734_v38 = vsub.f32 %v2347_v10, %v726_v30  ;;  %v742_v24 = vmul.f32 0.0004837513, %v2597_v9 }
 0x116   : > { %v853_v25 = vadd.f32 -0.0013887316, %v845_v51  ;;  %v877_v61 = vmul.f32 0.5, %v781_v33  ;;  %vm2675_vm0 = vcmp.eq.s32.totalorder %v917_v14, 1  ;;  %v758_v17 = vmul.f32 7.54979e-08, %v2597_v9 }
 0x117   : > { %v2204_v13 = vtrunc.f32 %v2597_v9  ;;  %v273_v48 = vrot.slane %v233_v43, %v2288_v22  ;;  %v805_v11 = vmul.f32 %v797_v37, %v781_v33  ;;  %v750_v56 = vsub.f32 %v734_v38, %v742_v24 }
 0x118   : > { %v861_v19 = vmul.f32 %v853_v25, %v781_v33  ;;  %v277_v10 = vrot.slane %v2581_v60, %v2288_v22  ;;  %v1365_v20 = vsel %vm1304_vm11, %v1357_v34, %v1246_v44  ;;  %v821_v21 = vmul.f32 %v781_v33, %v765_v50 }
 0x119   : > { %v2688_v57 = vcvt.f32.s32 %v2204_v13  ;;  %v2691_v46 = vmul.f32 %v2305_v36, %v273_v48  ;;  %v813_v9 = vadd.f32 -0.16666655, %v805_v11  ;;  %v893_v55 = vmul.f32 %v781_v33, %v781_v33 }
 0x11a   : > { %v869_v32 = vadd.f32 0.041666646, %v861_v19  ;;  %v766_v54 = vsub.f32 %v750_v56, %v758_v17  ;;  %v2694_v43 = vsel %vm1313_vm12, %v1308_v52, %v1134_v53  ;;  %vm2696_vm1 = vcmp.eq.s32.totalorder %v949_v63, 2 }
 0x11b   : > { %v303_v60 = vmul.f32 0.63661975, %v2691_v46  ;;  %v2702_v62 = vmul.f32 %v2305_v36, %v277_v10  ;;  %v829_v39 = vmul.f32 %v821_v21, %v813_v9  ;;  %v885_v41 = vsub.f32 1.0, %v877_v61 }
 0x11c   : > { %1794 = vxpose.xlu0.b32.start [1/4] (short) %v1316_v1, 128  ;;  %v901_v5 = vmul.f32 %v893_v55, %v869_v32  ;;  %v782_v42 = vmul.f32 %v766_v54, %v766_v54  ;;  %v2706_v59 = vsel %vm1313_vm12, %v1365_v20, %v2643_v15  ;;  %vm2708_vm2 = vcmp.eq.s32.totalorder %v989_v3, 2 }
 0x11d   : > { %v2713_v40 = vadd.s32 1, %v2688_v57  ;;  %v311_v0 = vadd.f32 0.5, %v303_v60  ;;  %v837_v45 = vadd.f32 %v829_v39, %v765_v50  ;;  %v918_v1 = vand.u32 1, %v2688_v57 }
 0x11e   : > { %v909_v12 = vadd.f32 %v901_v5, %v885_v41  ;;  %v790_v49 = vmul.f32 -0.00019515296, %v782_v42  ;;  %v846_v33 = vmul.f32 2.4433157e-05, %v782_v42  ;;  %v878_v30 = vmul.f32 0.5, %v782_v42 }
 0x11f   : > { %v950_v6 = vand.u32 2, %v2688_v57  ;;  %v2718_v15 = vmul.f32 0.63661975, %v2702_v62  ;;  %v2724_v50 = vfloor.f32 %v311_v0  ;;  %v990_v52 = vand.u32 2, %v2713_v40 }
 0x120   : > { %1795 = vxpose.xlu0.b32.cont [2/4] (short) %v1372_v58, 128  ;;  %v933_v53 = vsel %vm2675_vm0, %v909_v12, %v837_v45  ;;  %v941_v7 = vsel %vm2675_vm0, %v837_v45, %v909_v12  ;;  %v798_v14 = vadd.f32 0.008332161, %v790_v49  ;;  %v854_v51 = vadd.f32 -0.0013887316, %v846_v33 }
 0x121   : > { %v965_v44 = vsub.f32 0.0, %v933_v53  ;;  %v1005_v18 = vsub.f32 0.0, %v941_v7  ;;  %v822_v63 = vmul.f32 %v782_v42, %v766_v54  ;;  %v886_v3 = vsub.f32 1.0, %v878_v30 }
 0x122   : > { %v806_v34 = vmul.f32 %v798_v14, %v782_v42  ;;  %v894_v37 = vmul.f32 %v782_v42, %v782_v42  ;;  %v862_v38 = vmul.f32 %v854_v51, %v782_v42  ;;  %vm2731_vm3 = vcmp.eq.s32.totalorder %v918_v1, 1 }
 0x123   : > { %v973_v58 = vsel %vm2696_vm1, %v965_v44, %v933_v53  ;;  %v1013_v25 = vsel %vm2708_vm2, %v1005_v18, %v941_v7  ;;  %v327_v61 = vmul.f32 1.5703125, %v2724_v50  ;;  %v343_v13 = vmul.f32 0.0004837513, %v2724_v50 }
 0x124   : > { %v1388_v16 = vrot.slane %v1013_v25, 7  ;;  %v1412_v17 = vrot.slane %v973_v58, 7  ;;  %v2190_v48 = vtrunc.f32 %v2724_v50  ;;  %v1428_v11 = vrot.slane %v1013_v25, 6 }
 0x125   : > { %v1444_v19 = vrot.slane %v973_v58, 6  ;;  %v1460_v56 = vrot.slane %v1013_v25, 5  ;;  %v814_v10 = vadd.f32 -0.16666655, %v806_v34  ;;  %v870_v21 = vadd.f32 0.041666646, %v862_v38 }
 0x126   : > { %v1620_v20 = vsel %vm1259_vm4, %v973_v58, %v1388_v16  ;;  %v1508_v57 = vrot.slane %v973_v58, 4  ;;  %v1524_v9 = vrot.slane %v1013_v25, 3  ;;  %v1476_v32 = vrot.slane %v973_v58, 5 }
 0x127   : > { %v1628_v55 = vsel %vm1268_vm5, %v1620_v20, %v1412_v17  ;;  %v830_v47 = vmul.f32 %v822_v63, %v814_v10  ;;  %v1540_v60 = vrot.slane %v973_v58, 3  ;;  %v1492_v39 = vrot.slane %v1013_v25, 4 }
 0x128   : > { %v1636_v41 = vsel %vm1277_vm7, %v1628_v55, %v1428_v11  ;;  %v902_v5 = vmul.f32 %v894_v37, %v870_v21  ;;  %v1556_v42 = vrot.slane %v1013_v25, 2  ;;  %v1572_v0 = vrot.slane %v973_v58, 2 }
 0x129   : > { %v1644_v35 = vsel %vm1286_vm9, %v1636_v41, %v1444_v19  ;;  %v838_v40 = vadd.f32 %v830_v47, %v766_v54  ;;  %v1676_v45 = vsel %vm1259_vm4, %v1508_v57, %v1524_v9  ;;  %v335_v33 = vsub.f32 %v2691_v46, %v327_v61 }
 0x12a   : > { %v1652_v12 = vsel %vm1295_vm10, %v1644_v35, %v1460_v56  ;;  %v910_v49 = vadd.f32 %v902_v5, %v886_v3  ;;  %v1684_v1 = vsel %vm1268_vm5, %v1676_v45, %v1540_v60  ;;  %1826 = vxpose.xlu1.b32.start [1/4] (short) %v2694_v43, 128  ;;  %v1588_v53 = vrot.slane %v1013_v25, 1 }
 0x12b   : > { %v1660_v30 = vsel %vm1304_vm11, %v1652_v12, %v1476_v32  ;;  %v1604_v7 = vrot.slane %v973_v58, 1  ;;  %v1692_v14 = vsel %vm1277_vm7, %v1684_v1, %v1556_v42  ;;  %v351_v63 = vsub.f32 %v335_v33, %v343_v13 }
 0x12c   : > { %v1668_v54 = vsel %vm1313_vm12, %v1660_v30, %v1492_v39  ;;  %v934_v44 = vsel %vm2731_vm3, %v910_v49, %v838_v40  ;;  %v942_v18 = vsel %vm2731_vm3, %v838_v40, %v910_v49  ;;  %v1700_v51 = vsel %vm1286_vm9, %v1692_v14, %v1572_v0 }
 0x12d   : > { %1796 = vxpose.xlu0.b32.cont [3/4] (short) %v1668_v54, 128  ;;  %v966_v46 = vsub.f32 0.0, %v934_v44  ;;  %v1006_v34 = vsub.f32 0.0, %v942_v18  ;;  %v1708_v43 = vsel %vm1295_vm10, %v1700_v51, %v1588_v53  ;;  %vm958_vm6 = vcmp.eq.s32.totalorder %v950_v6, 2 }
 0x12e   : > { %vm998_vm8 = vcmp.eq.s32.totalorder %v990_v52, 2  ;;  %v1716_v3 = vsel %vm1304_vm11, %v1708_v43, %v1604_v7  ;;  %v359_v37 = vmul.f32 7.54979e-08, %v2724_v50  ;;  %1827 = vxpose.xlu1.b32.cont [2/4] (short) %v2706_v59, 128  ;;  %v638_v24 = vrot.slane %v2342_v4, %v2291_v23 }
 0x12f   : > { %v974_v58 = vsel %vm958_vm6, %v966_v46, %v934_v44  ;;  %v1014_v38 = vsel %vm998_vm8, %v1006_v34, %v942_v18  ;;  %v1724_v17 = vsel %vm1313_vm12, %v1716_v3, %v1013_v25  ;;  %v2764_v52 = vcvt.f32.s32 %v2190_v48 }
 0x130   : > { %v1389_v61 = vrot.slane %v1014_v38, 7  ;;  %v1413_v16 = vrot.slane %v974_v58, 7  ;;  %v2762_v11 = vsub.f32 %v351_v63, %v359_v37  ;;  %v1429_v13 = vrot.slane %v1014_v38, 6 }
 0x131   : > { %1797 = vxpose.xlu0.b32.end [4/4] (short) %v1724_v17, 128  ;;  %v1509_v6 = vrot.slane %v974_v58, 4  ;;  %v312_v50 = vadd.f32 0.5, %v2718_v15  ;;  %v1445_v19 = vrot.slane %v974_v58, 6  ;;  %v1525_v56 = vrot.slane %v1014_v38, 3 }
 0x132   : > { %v1621_v59 = vsel %vm1259_vm4, %v974_v58, %v1389_v61  ;;  %v1541_v10 = vrot.slane %v974_v58, 3  ;;  %v1461_v20 = vrot.slane %v1014_v38, 5  ;;  %v1477_v21 = vrot.slane %v974_v58, 5 }
 0x133   : > { %v1493_v57 = vrot.slane %v1014_v38, 4  ;;  %v1629_v9 = vsel %vm1268_vm5, %v1621_v59, %v1413_v16  ;;  %v1557_v32 = vrot.slane %v1014_v38, 2  ;;  %v1677_v55 = vsel %vm1259_vm4, %v1509_v6, %v1525_v56 }
 0x134   : > { %v1637_v25 = vsel %vm1277_vm7, %v1629_v9, %v1429_v13  ;;  %v383_v48 = vmul.f32 %v2762_v11, %v2762_v11  ;;  %v1573_v47 = vrot.slane %v974_v58, 2  ;;  %v1589_v60 = vrot.slane %v1014_v38, 1 }
 0x135   : > { %v1645_v15 = vsel %vm1286_vm9, %v1637_v25, %v1445_v19  ;;  %v1685_v39 = vsel %vm1268_vm5, %v1677_v55, %v1541_v10  ;;  %v1605_v5 = vrot.slane %v974_v58, 1  ;;  %v519_v30 = vand.u32 1, %v2764_v52 }
 0x136   : > { %v1653_v41 = vsel %vm1295_vm10, %v1645_v15, %v1461_v20  ;;  %v1693_v42 = vsel %vm1277_vm7, %v1685_v39, %v1557_v32  ;;  %v391_v35 = vmul.f32 -0.00019515296, %v383_v48  ;;  %v447_v45 = vmul.f32 2.4433157e-05, %v383_v48 }
 0x137   : > { %v1661_v40 = vsel %vm1304_vm11, %v1653_v41, %v1477_v21  ;;  %v1701_v0 = vsel %vm1286_vm9, %v1693_v42, %v1573_v47  ;;  %v479_v12 = vmul.f32 0.5, %v383_v48  ;;  %v423_v7 = vmul.f32 %v383_v48, %v2762_v11 }
 0x138   : > { %v1669_v49 = vsel %vm1313_vm12, %v1661_v40, %v1493_v57  ;;  %v1709_v1 = vsel %vm1295_vm10, %v1701_v0, %v1589_v60  ;;  %v399_v33 = vadd.f32 0.008332161, %v391_v35  ;;  %v455_v14 = vadd.f32 -0.0013887316, %v447_v45 }
 0x139   : > { %1828 = vxpose.xlu1.b32.cont [3/4] (short) %v1669_v49, 128  ;;  %v1717_v53 = vsel %vm1304_vm11, %v1709_v1, %v1605_v5  ;;  %v583_v54 = vadd.s32 1, %v2764_v52  ;;  %v495_v18 = vmul.f32 %v383_v48, %v383_v48  ;;  %v320_v51 = vfloor.f32 %v312_v50 }
 0x13a   : > { %v407_v44 = vmul.f32 %v399_v33, %v383_v48  ;;  %v678_v46 = vrot.slane %v638_v24, %v2291_v23  ;;  %v463_v34 = vmul.f32 %v455_v14, %v383_v48  ;;  %v487_v43 = vsub.f32 1.0, %v479_v12 }
 0x13b   : > { %v642_v63 = vrot.slane %v2342_v4, %v625_v26  ;;  %v241_v3 = vrot.slane %v2342_v4, %v224_v27  ;;  %v1725_v37 = vsel %vm1313_vm12, %v1717_v53, %v1014_v38  ;;  %v328_v61 = vmul.f32 1.5703125, %v320_v51 }
 0x13c   : > { %v415_v58 = vadd.f32 -0.16666655, %v407_v44  ;;  %v245_v16 = vrot.slane %v2342_v4, %v228_v28  ;;  %v471_v24 = vadd.f32 0.041666646, %v463_v34  ;;  %v2192_v17 = vtrunc.f32 %v320_v51 }
 0x13d   : > { %1829 = vxpose.xlu1.b32.end [4/4] (short) %v1725_v37, 128  ;;  %v2797_v13 = vmul.f32 %v678_v46, %v2305_v36  ;;  %v682_v26 = vrot.slane %v642_v63, %v2291_v23  ;;  %v336_v50 = vsub.f32 %v2702_v62, %v328_v61  ;;  %v344_v27 = vmul.f32 0.0004837513, %v320_v51 }
 0x13e   : > { %v431_v6 = vmul.f32 %v423_v7, %v415_v58  ;;  %v281_v38 = vrot.slane %v241_v3, %v2288_v22  ;;  %v503_v19 = vmul.f32 %v495_v18, %v471_v24  ;;  %v2802_v59 = vcvt.f32.s32 %v2192_v17 }
 0x13f   : > { %v703_v56 = vmul.f32 0.63661975, %v2797_v13  ;;  %v2806_v28 = vmul.f32 %v682_v26, %v2305_v36  ;;  %v352_v20 = vsub.f32 %v336_v50, %v344_v27  ;;  %v360_v21 = vmul.f32 7.54979e-08, %v320_v51 }
 0x140   : > { %v439_v10 = vadd.f32 %v431_v6, %v2762_v11  ;;  %v2810_v57 = vmul.f32 %v2305_v36, %v281_v38  ;;  %v511_v9 = vadd.f32 %v503_v19, %v487_v43  ;;  %v551_v62 = vand.u32 2, %v2764_v52 }
 0x141   : > { %v591_v25 = vand.u32 2, %v583_v54  ;;  %v285_v32 = vrot.slane %v245_v16, %v2288_v22  ;;  %vm527_vm13 = vcmp.eq.s32.totalorder %v519_v30, 1  ;;  %v368_v55 = vsub.f32 %v352_v20, %v360_v21 }
 0x142   : > { %v2815_v48 = vadd.s32 1, %v2802_v59  ;;  %v535_v15 = vsel %vm527_vm13, %v511_v9, %v439_v10  ;;  %v543_v47 = vsel %vm527_vm13, %v439_v10, %v511_v9  ;;  %v711_v60 = vadd.f32 0.5, %v703_v56 }
 0x143   : > { %v704_v11 = vmul.f32 0.63661975, %v2806_v28  ;;  %v567_v39 = vsub.f32 0.0, %v535_v15  ;;  %v607_v41 = vsub.f32 0.0, %v543_v47  ;;  %v384_v5 = vmul.f32 %v368_v55, %v368_v55 }
 0x144   : > { %v305_v42 = vmul.f32 0.63661975, %v2810_v57  ;;  %vm559_vm14 = vcmp.eq.s32.totalorder %v551_v62, 2  ;;  %vm599_vm15 = vcmp.eq.s32.totalorder %v591_v25, 2  ;;  %v2820_v52 = vmul.f32 %v2305_v36, %v285_v32 }
 0x145   : > { %v2822_v22 = vsel %vm559_vm14, %v567_v39, %v535_v15  ;;  %v2824_v35 = vsel %vm599_vm15, %v607_v41, %v543_v47  ;;  %v392_v40 = vmul.f32 -0.00019515296, %v384_v5  ;;  %v520_v0 = vand.u32 1, %v2802_v59 }
 0x146   : > { %v1031_v45 = vrot.slane %v2824_v35, 7  ;;  %v1055_v12 = vrot.slane %v2822_v22, 7  ;;  %v552_v49 = vand.u32 2, %v2802_v59  ;;  %v592_v1 = vand.u32 2, %v2815_v48 }
 0x147   : > { %v400_v33 = vadd.f32 0.008332161, %v392_v40  ;;  %v719_v30 = vfloor.f32 %v711_v60  ;;  %v712_v53 = vadd.f32 0.5, %v704_v11  ;;  %v2831_v7 = vadd.f32 0.5, %v305_v42 }
 0x148   : > { %v1071_v14 = vrot.slane %v2824_v35, 6  ;;  %v1264_v54 = vsel %vm1259_vm4, %v2822_v22, %v1031_v45  ;;  %v448_v44 = vmul.f32 2.4433157e-05, %v384_v5  ;;  %v480_v18 = vmul.f32 0.5, %v384_v5 }
 0x149   : > { %v1087_v51 = vrot.slane %v2822_v22, 6  ;;  %v1273_v46 = vsel %vm1268_vm5, %v1264_v54, %v1055_v12  ;;  %v408_v34 = vmul.f32 %v400_v33, %v384_v5  ;;  %v1151_v43 = vrot.slane %v2822_v22, 4 }
 0x14a   : > { %v1282_v63 = vsel %vm1277_vm7, %v1273_v46, %v1071_v14  ;;  %v424_v3 = vmul.f32 %v384_v5, %v368_v55  ;;  %v456_v37 = vadd.f32 -0.0013887316, %v448_v44  ;;  %v1167_v58 = vrot.slane %v2824_v35, 3 }
 0x14b   : > { %v1103_v61 = vrot.slane %v2824_v35, 5  ;;  %v1291_v16 = vsel %vm1286_vm9, %v1282_v63, %v1087_v51  ;;  %v416_v24 = vadd.f32 -0.16666655, %v408_v34  ;;  %vm2843_vm0 = vcmp.eq.s32.totalorder %v520_v0, 1 }
 0x14c   : > { %v1183_v26 = vrot.slane %v2822_v22, 3  ;;  %v1119_v6 = vrot.slane %v2822_v22, 5  ;;  %v464_v50 = vmul.f32 %v456_v37, %v384_v5  ;;  %v488_v27 = vsub.f32 1.0, %v480_v18 }
 0x14d   : > { %v496_v38 = vmul.f32 %v384_v5, %v384_v5  ;;  %v1300_v19 = vsel %vm1295_vm10, %v1291_v16, %v1103_v61  ;;  %v432_v59 = vmul.f32 %v424_v3, %v416_v24  ;;  %v1199_v56 = vrot.slane %v2824_v35, 2 }
 0x14e   : > { %v1326_v10 = vsel %vm1259_vm4, %v1151_v43, %v1167_v58  ;;  %v472_v20 = vadd.f32 0.041666646, %v464_v50  ;;  %v1215_v21 = vrot.slane %v2822_v22, 2  ;;  %v727_v62 = vmul.f32 1.5703125, %v719_v30 }
 0x14f   : > { %v1334_v9 = vsel %vm1268_vm5, %v1326_v10, %v1183_v26  ;;  %v440_v25 = vadd.f32 %v432_v59, %v368_v55  ;;  %v1231_v32 = vrot.slane %v2824_v35, 1  ;;  %v743_v15 = vmul.f32 0.0004837513, %v719_v30 }
 0x150   : > { %v1342_v48 = vsel %vm1277_vm7, %v1334_v9, %v1199_v56  ;;  %v504_v47 = vmul.f32 %v496_v38, %v472_v20  ;;  %v735_v11 = vsub.f32 %v2797_v13, %v727_v62  ;;  %v2206_v39 = vtrunc.f32 %v719_v30 }
 0x151   : > { %v1350_v60 = vsel %vm1286_vm9, %v1342_v48, %v1215_v21  ;;  %v1247_v41 = vrot.slane %v2822_v22, 1  ;;  %v2865_v42 = vfloor.f32 %v712_v53  ;;  %v306_v55 = vmul.f32 0.63661975, %v2820_v52 }
 0x152   : > { %v1358_v5 = vsel %vm1295_vm10, %v1350_v60, %v1231_v32  ;;  %v1309_v40 = vsel %vm1304_vm11, %v1300_v19, %v1119_v6  ;;  %v512_v0 = vadd.f32 %v504_v47, %v488_v27  ;;  %v751_v45 = vsub.f32 %v735_v11, %v743_v15 }
 0x153   : > { %v759_v12 = vmul.f32 7.54979e-08, %v719_v30  ;;  %v1135_v33 = vrot.slane %v2824_v35, 4  ;;  %vm2870_vm1 = vcmp.eq.s32.totalorder %v552_v49, 2  ;;  %v1366_v22 = vsel %vm1304_vm11, %v1358_v5, %v1247_v41 }
 0x154   : > { %v2875_v14 = vcvt.f32.s32 %v2206_v39  ;;  %v536_v53 = vsel %vm2843_vm0, %v512_v0, %v440_v25  ;;  %v544_v54 = vsel %vm2843_vm0, %v440_v25, %v512_v0  ;;  %vm600_vm2 = vcmp.eq.s32.totalorder %v592_v1, 2 }
 0x155   : > { %vm1986_vm3 = vcmask 261120   ;;  %v2881_v44 = vsub.f32 %v751_v45, %v759_v12  ;;  %v1318_v30 = vsel %vm1313_vm12, %v1309_v40, %v1135_v33  ;;  %v568_v49 = vsub.f32 0.0, %v536_v53 }
 0x156   : > { %v608_v18 = vsub.f32 0.0, %v544_v54  ;;  %v728_v51 = vmul.f32 1.5703125, %v2865_v42  ;;  %v2892_v46 = vsel %vm1313_vm12, %v1366_v22, %v2824_v35  ;;  %v744_v34 = vmul.f32 0.0004837513, %v2865_v42 }
 0x157   : > { %v2896_v1 = vfloor.f32 %v2831_v7  ;;  %v2898_v43 = vadd.f32 0.5, %v306_v55  ;;  %v576_v63 = vsel %vm2870_vm1, %v568_v49, %v536_v53  ;;  %v2905_v37 = vadd.s32 1, %v2875_v14 }
 0x158   : > { %v2902_v3 = vsel %vm600_vm2, %v608_v18, %v544_v54  ;;  %v760_v58 = vmul.f32 7.54979e-08, %v2865_v42  ;;  %v1056_v61 = vrot.slane %v576_v63, 7  ;;  %v783_v16 = vmul.f32 %v2881_v44, %v2881_v44 }
 0x159   : > { %v1032_v35 = vrot.slane %v2902_v3, 7  ;;  %v919_v7 = vand.u32 1, %v2875_v14  ;;  %v1152_v24 = vrot.slane %v576_v63, 4  ;;  %v951_v17 = vand.u32 2, %v2875_v14 }
 0x15a   : > { %v736_v26 = vsub.f32 %v2806_v28, %v728_v51  ;;  %v2208_v6 = vtrunc.f32 %v2865_v42  ;;  %v1072_v50 = vrot.slane %v2902_v3, 6  ;;  %v1168_v38 = vrot.slane %v2902_v3, 3 }
 0x15b   : > { %v1265_v27 = vsel %vm1259_vm4, %v576_v63, %v1032_v35  ;;  %v1184_v19 = vrot.slane %v576_v63, 3  ;;  %v1088_v59 = vrot.slane %v576_v63, 6  ;;  %v1104_v56 = vrot.slane %v2902_v3, 5 }
 0x15c   : > { %v1274_v10 = vsel %vm1268_vm5, %v1265_v27, %v1056_v61  ;;  %v991_v20 = vand.u32 2, %v2905_v37  ;;  %v1200_v28 = vrot.slane %v2902_v3, 2  ;;  %v1327_v9 = vsel %vm1259_vm4, %v1152_v24, %v1168_v38 }
 0x15d   : > { %v1283_v21 = vsel %vm1277_vm7, %v1274_v10, %v1072_v50  ;;  %v791_v62 = vmul.f32 -0.00019515296, %v783_v16  ;;  %v1216_v32 = vrot.slane %v576_v63, 2  ;;  %v1335_v48 = vsel %vm1268_vm5, %v1327_v9, %v1184_v19 }
 0x15e   : > { %v1292_v25 = vsel %vm1286_vm9, %v1283_v21, %v1088_v59  ;;  %v847_v15 = vmul.f32 2.4433157e-05, %v783_v16  ;;  %v1232_v60 = vrot.slane %v2902_v3, 1  ;;  %v1343_v11 = vsel %vm1277_vm7, %v1335_v48, %v1200_v28 }
 0x15f   : > { %v1301_v47 = vsel %vm1295_vm10, %v1292_v25, %v1104_v56  ;;  %v1778_v39 = vpop.trf.xlu0  ;;  %v799_v41 = vadd.f32 0.008332161, %v791_v62  ;;  %v1120_v5 = vrot.slane %v576_v63, 5  ;;  %v1351_v42 = vsel %vm1286_vm9, %v1343_v11, %v1216_v32 }
 0x160   : > { %2003 = vst.msk [vmem:[%s2928_s27 + $0x80] sm:$0xff] %vm1986_vm3, %v1778_v39  ;;  %v855_v55 = vadd.f32 -0.0013887316, %v847_v15  ;;  %v879_v40 = vmul.f32 0.5, %v783_v16  ;;  %v1136_v0 = vrot.slane %v2902_v3, 4  ;;  %v1248_v45 = vrot.slane %v576_v63, 1 }
 0x161   : > { %v1359_v12 = vsel %vm1295_vm10, %v1351_v42, %v1232_v60  ;;  %v807_v33 = vmul.f32 %v799_v41, %v783_v16  ;;  %vm2940_vm6 = vcmp.eq.s32.totalorder %v919_v7, 1  ;;  %v1310_v22 = vsel %vm1304_vm11, %v1301_v47, %v1120_v5 }
 0x162   : > { %1858 = vxpose.xlu0.b32.start [1/4] (short) %v1318_v30, 128  ;;  %v823_v14 = vmul.f32 %v783_v16, %v2881_v44  ;;  %v863_v53 = vmul.f32 %v855_v55, %v783_v16  ;;  %v752_v54 = vsub.f32 %v736_v26, %v744_v34  ;;  %v1367_v49 = vsel %vm1304_vm11, %v1359_v12, %v1248_v45 }
 0x163   : > { %v815_v18 = vadd.f32 -0.16666655, %v807_v33  ;;  %v2947_v51 = vcvt.f32.s32 %v2208_v6  ;;  %v1779_v63 = vpop.trf.xlu0  ;;  %v329_v37 = vmul.f32 1.5703125, %v2896_v1  ;;  %v887_v61 = vsub.f32 1.0, %v879_v40 }
 0x164   : > { %v871_v35 = vadd.f32 0.041666646, %v863_v53  ;;  %v895_v7 = vmul.f32 %v783_v16, %v783_v16  ;;  %vm2950_vm8 = vcmp.eq.s32.totalorder %v951_v17, 2  ;;  %v2954_v30 = vsub.f32 %v752_v54, %v760_v58  ;;  %2004 = vst.msk [vmem:[%s2928_s27 + $0x88] sm:$0xff] %vm1986_vm3, %v1779_v63 }
 0x165   : > { %v1319_v34 = vsel %vm1313_vm12, %v1310_v22, %v1136_v0  ;;  %v831_v26 = vmul.f32 %v823_v14, %v815_v18  ;;  %v337_v6 = vsub.f32 %v2810_v57, %v329_v37  ;;  %v345_v50 = vmul.f32 0.0004837513, %v2896_v1 }
 0x166   : > { %1859 = vxpose.xlu0.b32.cont [2/4] (short) %v2892_v46, 128  ;;  %v1375_v16 = vsel %vm1313_vm12, %v1367_v49, %v2902_v3  ;;  %v903_v17 = vmul.f32 %v895_v7, %v871_v35  ;;  %vm2964_vm13 = vcmp.eq.s32.totalorder %v991_v20, 2  ;;  %v784_v58 = vmul.f32 %v2954_v30, %v2954_v30 }
 0x167   : > { %v839_v38 = vadd.f32 %v831_v26, %v2881_v44  ;;  %v984_v57 = vadd.s32 1, %v2947_v51  ;;  %v1780_v19 = vpop.trf.xlu0  ;;  %v353_v59 = vsub.f32 %v337_v6, %v345_v50  ;;  %v361_v56 = vmul.f32 7.54979e-08, %v2896_v1 }
 0x168   : > { %v911_v46 = vadd.f32 %v903_v17, %v887_v61  ;;  %v792_v10 = vmul.f32 -0.00019515296, %v784_v58  ;;  %v848_v21 = vmul.f32 2.4433157e-05, %v784_v58  ;;  %v920_v3 = vand.u32 1, %v2947_v51  ;;  %2005 = vst.msk [vmem:[%s2928_s27 + $0x90] sm:$0xff] %vm1986_vm3, %v1780_v19 }
 0x169   : > { %v880_v20 = vmul.f32 0.5, %v784_v58  ;;  %v952_v28 = vand.u32 2, %v2947_v51  ;;  %v2977_v9 = vsub.f32 %v353_v59, %v361_v56  ;;  %v2194_v44 = vtrunc.f32 %v2896_v1 }
 0x16a   : > { %v935_v62 = vsel %vm2940_vm6, %v911_v46, %v839_v38  ;;  %v943_v25 = vsel %vm2940_vm6, %v839_v38, %v911_v46  ;;  %v800_v32 = vadd.f32 0.008332161, %v792_v10  ;;  %v856_v48 = vadd.f32 -0.0013887316, %v848_v21 }
 0x16b   : > { %v967_v15 = vsub.f32 0.0, %v935_v62  ;;  %v1007_v47 = vsub.f32 0.0, %v943_v25  ;;  %v824_v60 = vmul.f32 %v784_v58, %v2954_v30  ;;  %v992_v11 = vand.u32 2, %v984_v57  ;;  %v1781_v39 = vpop.trf.xlu0 }
 0x16c   : > { %v808_v41 = vmul.f32 %v800_v32, %v784_v58  ;;  %v864_v5 = vmul.f32 %v856_v48, %v784_v58  ;;  %v888_v42 = vsub.f32 1.0, %v880_v20  ;;  %v896_v55 = vmul.f32 %v784_v58, %v784_v58  ;;  %2006 = vst.msk [vmem:[%s2928_s27 + $0x98] sm:$0xff] %vm1986_vm3, %v1781_v39 }
 0x16d   : > { %v2989_v1 = vsel %vm2950_vm8, %v967_v15, %v935_v62  ;;  %v2993_v40 = vsel %vm2964_vm13, %v1007_v47, %v943_v25  ;;  %vm2995_vm14 = vcmp.eq.s32.totalorder %v920_v3, 1  ;;  %v2999_v45 = vcvt.f32.s32 %v2194_v44  ;;  %v1746_v33 = vpop.trf.xlu1 }
 0x16e   : > { %v3003_v12 = vmul.f32 %v2977_v9, %v2977_v9  ;;  %1890 = vxpose.xlu1.b32.start [1/4] (short) %v1319_v34, 128  ;;  %v1390_v13 = vrot.slane %v2993_v40, 7  ;;  %v1414_v22 = vrot.slane %v2989_v1, 7  ;;  %v1430_v14 = vrot.slane %v2993_v40, 6  ;;  %1987 = vst.msk [vmem:[%s2928_s27] sm:$0xff] %vm1986_vm3, %v1746_v33 }
 0x16f   : > { %v3009_v53 = vfloor.f32 %v2898_v43  ;;  %v1446_v54 = vrot.slane %v2989_v1, 6  ;;  %v1462_v49 = vrot.slane %v2993_v40, 5  ;;  %v1478_v18 = vrot.slane %v2989_v1, 5  ;;  %v1782_v63 = vpop.trf.xlu0 }
 0x170   : > { %v816_v51 = vadd.f32 -0.16666655, %v808_v41  ;;  %v1622_v37 = vsel %vm1259_vm4, %v2989_v1, %v1390_v13  ;;  %v872_v35 = vadd.f32 0.041666646, %v864_v5  ;;  %vm3018_vm15 = vcmp.eq.s32.totalorder %v952_v28, 2  ;;  %2007 = vst.msk [vmem:[%s2928_s27 + $0xa0] sm:$0xff] %vm1986_vm3, %v1782_v63 }
 0x171   : > { %vm3022_vm0 = vcmp.eq.s32.totalorder %v992_v11, 2  ;;  %v1510_v7 = vrot.slane %v2989_v1, 4  ;;  %v1526_v24 = vrot.slane %v2993_v40, 3  ;;  %v1494_v34 = vrot.slane %v2993_v40, 4  ;;  %v1747_v58 = vpop.trf.xlu1 }
 0x172   : > { %v1630_v26 = vsel %vm1268_vm5, %v1622_v37, %v1414_v22  ;;  %v832_v6 = vmul.f32 %v824_v60, %v816_v51  ;;  %v1542_v50 = vrot.slane %v2989_v1, 3  ;;  %1891 = vxpose.xlu1.b32.cont [2/4] (short) %v1375_v16, 128  ;;  %v904_v27 = vmul.f32 %v896_v55, %v872_v35  ;;  %1988 = vst.msk [vmem:[%s2928_s27 + $0x8] sm:$0xff] %vm1986_vm3, %v1747_v58 }
 0x173   : > { %v1638_v17 = vsel %vm1277_vm7, %v1630_v26, %v1430_v14  ;;  %v1558_v38 = vrot.slane %v2993_v40, 2  ;;  %v1574_v57 = vrot.slane %v2989_v1, 2  ;;  %v1590_v56 = vrot.slane %v2993_v40, 1  ;;  %v1783_v10 = vpop.trf.xlu0 }
 0x174   : > { %v1646_v19 = vsel %vm1286_vm9, %v1638_v17, %v1446_v54  ;;  %v840_v59 = vadd.f32 %v832_v6, %v2954_v30  ;;  %v1678_v46 = vsel %vm1259_vm4, %v1510_v7, %v1526_v24  ;;  %v912_v21 = vadd.f32 %v904_v27, %v888_v42  ;;  %2008 = vst.msk [vmem:[%s2928_s27 + $0xa8] sm:$0xff] %vm1986_vm3, %v1783_v10 }
 0x175   : > { %v1654_v16 = vsel %vm1295_vm10, %v1646_v19, %v1462_v49  ;;  %v1686_v3 = vsel %vm1268_vm5, %v1678_v46, %v1542_v50  ;;  %v393_v20 = vmul.f32 -0.00019515296, %v3003_v12  ;;  %v1606_v30 = vrot.slane %v2989_v1, 1  ;;  %v1748_v47 = vpop.trf.xlu1 }
 0x176   : > { %v1662_v28 = vsel %vm1304_vm11, %v1654_v16, %v1478_v18  ;;  %v1694_v44 = vsel %vm1277_vm7, %v1686_v3, %v1558_v38  ;;  %v449_v62 = vmul.f32 2.4433157e-05, %v3003_v12  ;;  %v936_v32 = vsel %vm2995_vm14, %v912_v21, %v840_v59  ;;  %1989 = vst.msk [vmem:[%s2928_s27 + $0x10] sm:$0xff] %vm1986_vm3, %v1748_v47 }
 0x177   : > { %v1670_v25 = vsel %vm1313_vm12, %v1662_v28, %v1494_v34  ;;  %v944_v48 = vsel %vm2995_vm14, %v840_v59, %v912_v21  ;;  %v1702_v15 = vsel %vm1286_vm9, %v1694_v44, %v1574_v57  ;;  %v968_v60 = vsub.f32 0.0, %v936_v32  ;;  %v1784_v41 = vpop.trf.xlu0 }
 0x178   : > { %1860 = vxpose.xlu0.b32.cont [3/4] (short) %v1670_v25, 128  ;;  %v1008_v11 = vsub.f32 0.0, %v944_v48  ;;  %v1710_v39 = vsel %vm1295_vm10, %v1702_v15, %v1590_v56  ;;  %v401_v5 = vadd.f32 0.008332161, %v393_v20  ;;  %2009 = vst.msk [vmem:[%s2928_s27 + $0xb0] sm:$0xff] %vm1986_vm3, %v1784_v41  ;;  %v425_v55 = vmul.f32 %v3003_v12, %v2977_v9 }
 0x179   : > { %v1718_v42 = vsel %vm1304_vm11, %v1710_v39, %v1606_v30  ;;  %v457_v1 = vadd.f32 -0.0013887316, %v449_v62  ;;  %v521_v0 = vand.u32 1, %v2999_v45  ;;  %v976_v33 = vsel %vm3018_vm15, %v968_v60, %v936_v32  ;;  %v1749_v51 = vpop.trf.xlu1 }
 0x17a   : > { %v1016_v13 = vsel %vm3022_vm0, %v1008_v11, %v944_v48  ;;  %v481_v22 = vmul.f32 0.5, %v3003_v12  ;;  %v497_v14 = vmul.f32 %v3003_v12, %v3003_v12  ;;  %v1415_v49 = vrot.slane %v976_v33, 7  ;;  %1990 = vst.msk [vmem:[%s2928_s27 + $0x18] sm:$0xff] %vm1986_vm3, %v1749_v51 }
 0x17b   : > { %v1391_v54 = vrot.slane %v1016_v13, 7  ;;  %v1726_v18 = vsel %vm1313_vm12, %v1718_v42, %v2993_v40  ;;  %v409_v63 = vmul.f32 %v401_v5, %v3003_v12  ;;  %v1431_v37 = vrot.slane %v1016_v13, 6  ;;  %v1785_v7 = vpop.trf.xlu0 }
 0x17c   : > { %v1447_v35 = vrot.slane %v976_v33, 6  ;;  %v1463_v61 = vrot.slane %v1016_v13, 5  ;;  %1861 = vxpose.xlu0.b32.end [4/4] (short) %v1726_v18, 128  ;;  %v1511_v43 = vrot.slane %v976_v33, 4  ;;  %v1479_v24 = vrot.slane %v976_v33, 5  ;;  %2010 = vst.msk [vmem:[%s2928_s27 + $0xb8] sm:$0xff] %vm1986_vm3, %v1785_v7 }
 0x17d   : > { %v1623_v34 = vsel %vm1259_vm4, %v976_v33, %v1391_v54  ;;  %v1527_v26 = vrot.slane %v1016_v13, 3  ;;  %v1543_v6 = vrot.slane %v976_v33, 3  ;;  %v1495_v40 = vrot.slane %v1016_v13, 4  ;;  %v1750_v57 = vpop.trf.xlu1 }
 0x17e   : > { %v1631_v50 = vsel %vm1268_vm5, %v1623_v34, %v1415_v49  ;;  %v1559_v17 = vrot.slane %v1016_v13, 2  ;;  %v1575_v27 = vrot.slane %v976_v33, 2  ;;  %v417_v19 = vadd.f32 -0.16666655, %v409_v63  ;;  %1991 = vst.msk [vmem:[%s2928_s27 + $0x20] sm:$0xff] %vm1986_vm3, %v1750_v57 }
 0x17f   : > { %v1639_v58 = vsel %vm1277_vm7, %v1631_v50, %v1431_v37  ;;  %v1679_v38 = vsel %vm1259_vm4, %v1511_v43, %v1527_v26  ;;  %v465_v59 = vmul.f32 %v457_v1, %v3003_v12  ;;  %v1591_v46 = vrot.slane %v1016_v13, 1  ;;  %v1786_v21 = vpop.trf.xlu0 }
 0x180   : > { %v1647_v56 = vsel %vm1286_vm9, %v1639_v58, %v1447_v35  ;;  %v1607_v10 = vrot.slane %v976_v33, 1  ;;  %v1687_v16 = vsel %vm1268_vm5, %v1679_v38, %v1543_v6  ;;  %2011 = vst.msk [vmem:[%s2928_s27 + $0xc0] sm:$0xff] %vm1986_vm3, %v1786_v21  ;;  %v433_v28 = vmul.f32 %v425_v55, %v417_v19 }
 0x181   : > { %v1655_v3 = vsel %vm1295_vm10, %v1647_v56, %v1463_v61  ;;  %v1695_v20 = vsel %vm1277_vm7, %v1687_v16, %v1559_v17  ;;  %v473_v30 = vadd.f32 0.041666646, %v465_v59  ;;  %v489_v62 = vsub.f32 1.0, %v481_v22  ;;  %v1751_v15 = vpop.trf.xlu1 }
 0x182   : > { %v1663_v12 = vsel %vm1304_vm11, %v1655_v3, %v1479_v24  ;;  %v1703_v44 = vsel %vm1286_vm9, %v1695_v20, %v1575_v27  ;;  %v585_v25 = vadd.s32 1, %v2999_v45  ;;  %v441_v47 = vadd.f32 %v433_v28, %v2977_v9  ;;  %1992 = vst.msk [vmem:[%s2928_s27 + $0x28] sm:$0xff] %vm1986_vm3, %v1751_v15 }
 0x183   : > { %v1671_v32 = vsel %vm1313_vm12, %v1663_v12, %v1495_v40  ;;  %v1711_v48 = vsel %vm1295_vm10, %v1703_v44, %v1591_v46  ;;  %v505_v60 = vmul.f32 %v497_v14, %v473_v30  ;;  %v1787_v39 = vpop.trf.xlu0  ;;  %v330_v41 = vmul.f32 1.5703125, %v3009_v53 }
 0x184   : > { %1892 = vxpose.xlu1.b32.cont [3/4] (short) %v1671_v32, 128  ;;  %v1719_v11 = vsel %vm1304_vm11, %v1711_v48, %v1607_v10  ;;  %2012 = vst.msk [vmem:[%s2928_s27 + $0xc8] sm:$0xff] %vm1986_vm3, %v1787_v39  ;;  %v593_v42 = vand.u32 2, %v585_v25  ;;  %vm529_vm1 = vcmp.eq.s32.totalorder %v521_v0, 1  ;;  %v553_v55 = vand.u32 2, %v2999_v45 }
 0x185   : > { %v513_v5 = vadd.f32 %v505_v60, %v489_v62  ;;  %v338_v9 = vsub.f32 %v2820_v52, %v330_v41  ;;  %v346_v1 = vmul.f32 0.0004837513, %v3009_v53  ;;  %v1727_v33 = vsel %vm1313_vm12, %v1719_v11, %v1016_v13  ;;  %v1752_v22 = vpop.trf.xlu1 }
 0x186   : > { %v362_v49 = vmul.f32 7.54979e-08, %v3009_v53  ;;  %1993 = vst.msk [vmem:[%s2928_s27 + $0x30] sm:$0xff] %vm1986_vm3, %v1752_v22  ;;  %v646_v52 = vrot.slane %v2342_v4, %v629_v29  ;;  %vm601_vm2 = vcmp.eq.s32.totalorder %v593_v42, 2  ;;  %v2196_v13 = vtrunc.f32 %v3009_v53 }
 0x187   : > { %v537_v14 = vsel %vm529_vm1, %v513_v5, %v441_v47  ;;  %v545_v54 = vsel %vm529_vm1, %v441_v47, %v513_v5  ;;  %v1788_v18 = vpop.trf.xlu0  ;;  %v354_v45 = vsub.f32 %v338_v9, %v346_v1  ;;  %vm561_vm6 = vcmp.eq.s32.totalorder %v553_v55, 2 }
 0x188   : > { %1893 = vxpose.xlu1.b32.end [4/4] (short) %v1727_v33, 128  ;;  %v569_v0 = vsub.f32 0.0, %v537_v14  ;;  %v609_v51 = vsub.f32 0.0, %v545_v54  ;;  %2013 = vst.msk [vmem:[%s2928_s27 + $0xd0] sm:$0xff] %vm1986_vm3, %v1788_v18  ;;  %v686_v24 = vrot.slane %v646_v52, %v2291_v23  ;;  %v3128_v53 = vcvt.f32.s32 %v2196_v13 }
 0x189   : > { %v370_v37 = vsub.f32 %v354_v45, %v362_v49  ;;  %v1753_v35 = vpop.trf.xlu1  ;;  %v650_v34 = vrot.slane %v2342_v4, %v633_v31 }
 0x18a   : > { %v3118_v63 = vsel %vm601_vm2, %v609_v51, %v545_v54  ;;  %1994 = vst.msk [vmem:[%s2928_s27 + $0x38] sm:$0xff] %vm1986_vm3, %v1753_v35  ;;  %v3122_v43 = vsel %vm561_vm6, %v569_v0, %v537_v14  ;;  %v3139_v57 = vmul.f32 %v686_v24, %v2305_v36  ;;  %v522_v8 = vand.u32 1, %v3128_v53 }
 0x18b   : > { %v1789_v61 = vpop.trf.xlu0  ;;  %v1033_v7 = vrot.slane %v3118_v63, 7  ;;  %v386_v29 = vmul.f32 %v370_v37, %v370_v37  ;;  %v1057_v50 = vrot.slane %v3122_v43, 7  ;;  %v690_v31 = vrot.slane %v650_v34, %v2291_v23 }
 0x18c   : > { %2014 = vst.msk [vmem:[%s2928_s27 + $0xd8] sm:$0xff] %vm1986_vm3, %v1789_v61  ;;  %v586_v56 = vadd.s32 1, %v3128_v53  ;;  %v1153_v21 = vrot.slane %v3122_v43, 4  ;;  %v1169_v3 = vrot.slane %v3118_v63, 3  ;;  %v705_v12 = vmul.f32 0.63661975, %v3139_v57 }
 0x18d   : > { %v394_v26 = vmul.f32 -0.00019515296, %v386_v29  ;;  %v450_v6 = vmul.f32 2.4433157e-05, %v386_v29  ;;  %v1754_v40 = vpop.trf.xlu1  ;;  %v1266_v27 = vsel %vm1259_vm4, %v3122_v43, %v1033_v7  ;;  %v482_v59 = vmul.f32 0.5, %v386_v29 }
 0x18e   : > { %1995 = vst.msk [vmem:[%s2928_s27 + $0x40] sm:$0xff] %vm1986_vm3, %v1754_v40  ;;  %v1275_v10 = vsel %vm1268_vm5, %v1266_v27, %v1057_v50  ;;  %v426_v16 = vmul.f32 %v386_v29, %v370_v37  ;;  %v498_v23 = vmul.f32 %v386_v29, %v386_v29  ;;  %v1073_v44 = vrot.slane %v3118_v63, 6 }
 0x18f   : > { %v1790_v17 = vpop.trf.xlu0  ;;  %v402_v58 = vadd.f32 0.008332161, %v394_v26  ;;  %v458_v38 = vadd.f32 -0.0013887316, %v450_v6  ;;  %v1089_v62 = vrot.slane %v3122_v43, 6  ;;  %v554_v25 = vand.u32 2, %v3128_v53 }
 0x190   : > { %2015 = vst.msk [vmem:[%s2928_s27 + $0xe0] sm:$0xff] %vm1986_vm3, %v1790_v17  ;;  %v3158_v32 = vmul.f32 %v690_v31, %v2305_v36  ;;  %v490_v15 = vsub.f32 1.0, %v482_v59  ;;  %v713_v60 = vadd.f32 0.5, %v705_v12  ;;  %v1284_v39 = vsel %vm1277_vm7, %v1275_v10, %v1073_v44 }
 0x191   : > { %v410_v4 = vmul.f32 %v402_v58, %v386_v29  ;;  %v466_v19 = vmul.f32 %v458_v38, %v386_v29  ;;  %v1755_v46 = vpop.trf.xlu1  ;;  %v594_v41 = vand.u32 2, %v586_v56  ;;  %v1185_v5 = vrot.slane %v3122_v43, 3 }
 0x192   : > { %1996 = vst.msk [vmem:[%s2928_s27 + $0x48] sm:$0xff] %vm1986_vm3, %v1755_v46  ;;  %v706_v42 = vmul.f32 0.63661975, %v3158_v32  ;;  %v1328_v1 = vsel %vm1259_vm4, %v1153_v21, %v1169_v3  ;;  %v3166_v33 = vfloor.f32 %v713_v60  ;;  %v1105_v22 = vrot.slane %v3118_v63, 5 }
 0x193   : > { %v1791_v20 = vpop.trf.xlu0  ;;  %v418_v28 = vadd.f32 -0.16666655, %v410_v4  ;;  %v474_v30 = vadd.f32 0.041666646, %v466_v19  ;;  %vm530_vm8 = vcmp.eq.s32.totalorder %v522_v8, 1  ;;  %v1293_v14 = vsel %vm1286_vm9, %v1284_v39, %v1089_v62 }
 0x194   : > { %2016 = vst.msk [vmem:[%s2928_s27 + $0xe8] sm:$0xff] %vm1986_vm3, %v1791_v20  ;;  %v729_v18 = vmul.f32 1.5703125, %v3166_v33  ;;  %v1336_v52 = vsel %vm1268_vm5, %v1328_v1, %v1185_v5  ;;  %v714_v13 = vadd.f32 0.5, %v706_v42  ;;  %vm562_vm13 = vcmp.eq.s32.totalorder %v554_v25, 2 }
 0x195   : > { %v434_v48 = vmul.f32 %v426_v16, %v418_v28  ;;  %v506_v47 = vmul.f32 %v498_v23, %v474_v30  ;;  %v1756_v11 = vpop.trf.xlu1  ;;  %vm602_vm14 = vcmp.eq.s32.totalorder %v594_v41, 2  ;;  %v1302_v61 = vsel %vm1295_vm10, %v1293_v14, %v1105_v22 }
 0x196   : > { %1997 = vst.msk [vmem:[%s2928_s27 + $0x50] sm:$0xff] %vm1986_vm3, %v1756_v11  ;;  %v737_v26 = vsub.f32 %v3139_v57, %v729_v18  ;;  %v1121_v40 = vrot.slane %v3122_v43, 5  ;;  %v1217_v50 = vrot.slane %v3122_v43, 2  ;;  %v3191_v27 = vfloor.f32 %v714_v13 }
 0x197   : > { %v1792_v55 = vpop.trf.xlu0  ;;  %v442_v9 = vadd.f32 %v434_v48, %v370_v37  ;;  %v514_v36 = vadd.f32 %v506_v47, %v490_v15  ;;  %v1201_v37 = vrot.slane %v3118_v63, 2  ;;  %v745_v57 = vmul.f32 0.0004837513, %v3166_v33 }
 0x198   : > { %2017 = vst.msk [vmem:[%s2928_s27 + $0xf0] sm:$0xff] %vm1986_vm3, %v1792_v55  ;;  %v1137_v31 = vrot.slane %v3118_v63, 4  ;;  %v1311_v4 = vsel %vm1304_vm11, %v1302_v61, %v1121_v40  ;;  %v761_v16 = vmul.f32 7.54979e-08, %v3166_v33  ;;  %v2210_v28 = vtrunc.f32 %v3166_v33 }
 0x199   : > { %v538_v54 = vsel %vm530_vm8, %v514_v36, %v442_v9  ;;  %v546_v49 = vsel %vm530_vm8, %v442_v9, %v514_v36  ;;  %v1757_v0 = vpop.trf.xlu1  ;;  %v1344_v34 = vsel %vm1277_vm7, %v1336_v52, %v1201_v37  ;;  %v753_v10 = vsub.f32 %v737_v26, %v745_v57 }
 0x19a   : > { %v570_v51 = vsub.f32 0.0, %v538_v54  ;;  %v610_v45 = vsub.f32 0.0, %v546_v49  ;;  %1998 = vst.msk [vmem:[%s2928_s27 + $0x58] sm:$0xff] %vm1986_vm3, %v1757_v0  ;;  %v1352_v59 = vsel %vm1286_vm9, %v1344_v34, %v1217_v50  ;;  %v730_v30 = vmul.f32 1.5703125, %v3191_v27 }
 0x19b   : > { %v1793_v35 = vpop.trf.xlu0  ;;  %v1233_v12 = vrot.slane %v3118_v63, 1  ;;  %v3215_v44 = vsub.f32 %v753_v10, %v761_v16  ;;  %v1320_v62 = vsel %vm1313_vm12, %v1311_v4, %v1137_v31  ;;  %v1249_v15 = vrot.slane %v3122_v43, 1 }
 0x19c   : > { %v3178_v7 = vsel %vm562_vm13, %v570_v51, %v538_v54  ;;  %v3180_v29 = vsel %vm602_vm14, %v610_v45, %v546_v49  ;;  %2018 = vst.msk [vmem:[%s2928_s27 + $0xf8] sm:$0xff] %vm1986_vm3, %v1793_v35  ;;  %v2211_v42 = vcvt.f32.s32 %v2210_v28  ;;  %v738_v55 = vsub.f32 %v3158_v32, %v730_v30 }
 0x19d   : > { %v1034_v24 = vrot.slane %v3180_v29, 7  ;;  %v1058_v53 = vrot.slane %v3178_v7, 7  ;;  %v1758_v6 = vpop.trf.xlu1  ;;  %v1154_v17 = vrot.slane %v3178_v7, 4  ;;  %v1170_v38 = vrot.slane %v3180_v29, 3 }
 0x19e   : > { %1999 = vst.msk [vmem:[%s2928_s27 + $0x60] sm:$0xff] %vm1986_vm3, %v1758_v6  ;;  %v1186_v8 = vrot.slane %v3178_v7, 3  ;;  %v1074_v56 = vrot.slane %v3180_v29, 6  ;;  %v1202_v3 = vrot.slane %v3180_v29, 2  ;;  %v1090_v25 = vrot.slane %v3178_v7, 6 }
 0x19f   : > { %v1267_v58 = vsel %vm1259_vm4, %v3178_v7, %v1034_v24  ;;  %v1329_v46 = vsel %vm1259_vm4, %v1154_v17, %v1170_v38  ;;  %v1360_v47 = vsel %vm1295_vm10, %v1352_v59, %v1233_v12  ;;  %v1218_v60 = vrot.slane %v3178_v7, 2 }
 0x1a0   : > { %v1276_v19 = vsel %vm1268_vm5, %v1267_v58, %v1058_v53  ;;  %v1337_v20 = vsel %vm1268_vm5, %v1329_v46, %v1186_v8  ;;  %v785_v11 = vmul.f32 %v3215_v44, %v3215_v44  ;;  %v746_v9 = vmul.f32 0.0004837513, %v3191_v27 }
 0x1a1   : > { %v1759_v21 = vpop.trf.xlu1  ;;  %v1285_v23 = vsel %vm1277_vm7, %v1276_v19, %v1074_v56  ;;  %v1345_v48 = vsel %vm1277_vm7, %v1337_v20, %v1202_v3  ;;  %v1106_v43 = vrot.slane %v3180_v29, 5  ;;  %v1122_v22 = vrot.slane %v3178_v7, 5 }
 0x1a2   : > { %2000 = vst.msk [vmem:[%s2928_s27 + $0x68] sm:$0xff] %vm1986_vm3, %v1759_v21  ;;  %v1294_v5 = vsel %vm1286_vm9, %v1285_v23, %v1090_v25  ;;  %v1353_v36 = vsel %vm1286_vm9, %v1345_v48, %v1218_v60  ;;  %v793_v1 = vmul.f32 -0.00019515296, %v785_v11  ;;  %v849_v33 = vmul.f32 2.4433157e-05, %v785_v11 }
 0x1a3   : > { %v1368_v14 = vsel %vm1304_vm11, %v1360_v47, %v1249_v15  ;;  %v1234_v54 = vrot.slane %v3180_v29, 1  ;;  %v754_v49 = vsub.f32 %v738_v55, %v746_v9  ;;  %v1303_v32 = vsel %vm1295_vm10, %v1294_v5, %v1106_v43 }
 0x1a4   : > { %v801_v18 = vadd.f32 0.008332161, %v793_v1  ;;  %v857_v0 = vadd.f32 -0.0013887316, %v849_v33  ;;  %v762_v51 = vmul.f32 7.54979e-08, %v3191_v27  ;;  %v2212_v61 = vtrunc.f32 %v3191_v27 }
 0x1a5   : > { %v1810_v39 = vpop.trf.xlu0  ;;  %v1760_v41 = vpop.trf.xlu1  ;;  %v1250_v52 = vrot.slane %v3178_v7, 1  ;;  %v1361_v13 = vsel %vm1295_vm10, %v1353_v36, %v1234_v54  ;;  %v921_v35 = vand.u32 1, %v2211_v42  ;;  %v881_v34 = vmul.f32 0.5, %v785_v11 }
 0x1a6   : > { %2019 = vst.msk [vmem:[%s2928_s27 + $0x100] sm:$0xff] %vm1986_vm3, %v1810_v39  ;;  %2001 = vst.msk [vmem:[%s2928_s27 + $0x70] sm:$0xff] %vm1986_vm3, %v1760_v41  ;;  %v809_v24 = vmul.f32 %v801_v18, %v785_v11  ;;  %v865_v53 = vmul.f32 %v857_v0, %v785_v11  ;;  %v3246_v26 = vsub.f32 %v754_v49, %v762_v51  ;;  %v953_v40 = vand.u32 2, %v2211_v42 }
 0x1a7   : > { %v1312_v6 = vsel %vm1304_vm11, %v1303_v32, %v1122_v22  ;;  %v825_v7 = vmul.f32 %v785_v11, %v3215_v44  ;;  %v985_v50 = vadd.s32 1, %v2211_v42  ;;  %v897_v27 = vmul.f32 %v785_v11, %v785_v11 }
 0x1a8   : > { %v817_v17 = vadd.f32 -0.16666655, %v809_v24  ;;  %v873_v58 = vadd.f32 0.041666646, %v865_v53  ;;  %v786_v38 = vmul.f32 %v3246_v26, %v3246_v26  ;;  %v1138_v57 = vrot.slane %v3180_v29, 4 }
 0x1a9   : > { %v1811_v45 = vpop.trf.xlu0  ;;  %v1761_v37 = vpop.trf.xlu1  ;;  %v1376_v31 = vsel %vm1313_vm12, %v1368_v14, %v3118_v63  ;;  %v1369_v4 = vsel %vm1304_vm11, %v1361_v13, %v1250_v52  ;;  %v3256_v19 = vcvt.f32.s32 %v2212_v61  ;;  %v889_v56 = vsub.f32 1.0, %v881_v34 }
 0x1aa   : > { %2020 = vst.msk [vmem:[%s2928_s27 + $0x108] sm:$0xff] %vm1986_vm3, %v1811_v45  ;;  %2002 = vst.msk [vmem:[%s2928_s27 + $0x78] sm:$0xff] %vm1986_vm3, %v1761_v37  ;;  %v833_v59 = vmul.f32 %v825_v7, %v817_v17  ;;  %v905_v46 = vmul.f32 %v897_v27, %v873_v58  ;;  %v794_v10 = vmul.f32 -0.00019515296, %v786_v38  ;;  %v1321_v16 = vsel %vm1313_vm12, %v1312_v6, %v1138_v57 }
 0x1ab   : > { %vm3261_vm15 = vcmp.eq.s32.totalorder %v921_v35, 1  ;;  %v993_v63 = vand.u32 2, %v985_v50  ;;  %v850_v3 = vmul.f32 2.4433157e-05, %v786_v38  ;;  %vm3266_vm0 = vcmp.eq.s32.totalorder %v953_v40, 2 }
 0x1ac   : > { %v841_v20 = vadd.f32 %v833_v59, %v3215_v44  ;;  %v913_v28 = vadd.f32 %v905_v46, %v889_v56  ;;  %v802_v23 = vadd.f32 0.008332161, %v794_v10  ;;  %v1377_v25 = vsel %vm1313_vm12, %v1369_v4, %v3180_v29 }
 0x1ad   : > { %1922 = vxpose.xlu0.b32.start [1/4] (short) %v1320_v62, 128  ;;  %v1812_v8 = vpop.trf.xlu0  ;;  %v858_v48 = vadd.f32 -0.0013887316, %v850_v3  ;;  %v922_v15 = vand.u32 1, %v3256_v19  ;;  %v3274_v47 = vadd.s32 1, %v3256_v19  ;;  %v882_v39 = vmul.f32 0.5, %v786_v38 }
 0x1ae   : > { %2021 = vst.msk [vmem:[%s2928_s27 + $0x110] sm:$0xff] %vm1986_vm3, %v1812_v8  ;;  %v937_v44 = vsel %vm3261_vm15, %v913_v28, %v841_v20  ;;  %v945_v60 = vsel %vm3261_vm15, %v841_v20, %v913_v28  ;;  %v810_v11 = vmul.f32 %v802_v23, %v786_v38  ;;  %vm1001_vm1 = vcmp.eq.s32.totalorder %v993_v63, 2 }
 0x1af   : > { %v969_v29 = vsub.f32 0.0, %v937_v44  ;;  %v1009_v41 = vsub.f32 0.0, %v945_v60  ;;  %v866_v5 = vmul.f32 %v858_v48, %v786_v38  ;;  %v826_v55 = vmul.f32 %v786_v38, %v3246_v26 }
 0x1b0   : > { %v818_v42 = vadd.f32 -0.16666655, %v810_v11  ;;  %v898_v9 = vmul.f32 %v786_v38, %v786_v38  ;;  %v954_v43 = vand.u32 2, %v3256_v19  ;;  %vm3292_vm2 = vcmp.eq.s32.totalorder %v922_v15, 1 }
 0x1b1   : > { %1923 = vxpose.xlu0.b32.cont [2/4] (short) %v1376_v31, 128  ;;  %v1842_v12 = vpop.trf.xlu1  ;;  %v1813_v62 = vpop.trf.xlu0  ;;  %v3288_v33 = vsel %vm3266_vm0, %v969_v29, %v937_v44  ;;  %v3290_v22 = vsel %vm1001_vm1, %v1009_v41, %v945_v60  ;;  %v874_v14 = vadd.f32 0.041666646, %v866_v5  ;;  %v890_v18 = vsub.f32 1.0, %v882_v39 }
 0x1b2   : > { %2035 = vst.msk [vmem:[%s2928_s27 + $0x180] sm:$0xff] %vm1986_vm3, %v1842_v12  ;;  %2022 = vst.msk [vmem:[%s2928_s27 + $0x118] sm:$0xff] %vm1986_vm3, %v1813_v62  ;;  %v1392_v49 = vrot.slane %v3290_v22, 7  ;;  %v1416_v32 = vrot.slane %v3288_v33, 7  ;;  %v994_v0 = vand.u32 2, %v3274_v47  ;;  %v1432_v51 = vrot.slane %v3290_v22, 6 }
 0x1b3   : > { %v1448_v45 = vrot.slane %v3288_v33, 6  ;;  %v1464_v52 = vrot.slane %v3290_v22, 5  ;;  %v834_v13 = vmul.f32 %v826_v55, %v818_v42  ;;  %v906_v35 = vmul.f32 %v898_v9, %v874_v14 }
 0x1b4   : > { %v1624_v37 = vsel %vm1259_vm4, %v3288_v33, %v1392_v49  ;;  %v1512_v61 = vrot.slane %v3288_v33, 4  ;;  %v1528_v24 = vrot.slane %v3290_v22, 3  ;;  %v1480_v6 = vrot.slane %v3288_v33, 5 }
 0x1b5   : > { %v1843_v36 = vpop.trf.xlu1  ;;  %v1814_v1 = vpop.trf.xlu0  ;;  %v1632_v7 = vsel %vm1268_vm5, %v1624_v37, %v1416_v32  ;;  %v842_v40 = vadd.f32 %v834_v13, %v3246_v26  ;;  %v1544_v50 = vrot.slane %v3288_v33, 3  ;;  %v1496_v17 = vrot.slane %v3290_v22, 4 }
 0x1b6   : > { %2036 = vst.msk [vmem:[%s2928_s27 + $0x188] sm:$0xff] %vm1986_vm3, %v1843_v36  ;;  %2023 = vst.msk [vmem:[%s2928_s27 + $0x120] sm:$0xff] %vm1986_vm3, %v1814_v1  ;;  %v1640_v58 = vsel %vm1277_vm7, %v1632_v7, %v1432_v51  ;;  %v914_v27 = vadd.f32 %v906_v35, %v890_v18  ;;  %v1560_v38 = vrot.slane %v3290_v22, 2  ;;  %v1576_v26 = vrot.slane %v3288_v33, 2 }
 0x1b7   : > { %v1648_v8 = vsel %vm1286_vm9, %v1640_v58, %v1448_v45  ;;  %v1592_v57 = vrot.slane %v3290_v22, 1  ;;  %v1680_v31 = vsel %vm1259_vm4, %v1512_v61, %v1528_v24  ;;  %vm962_vm6 = vcmp.eq.s32.totalorder %v954_v43, 2 }
 0x1b8   : > { %v1656_v4 = vsel %vm1295_vm10, %v1648_v8, %v1464_v52  ;;  %v938_v19 = vsel %vm3292_vm2, %v914_v27, %v842_v40  ;;  %v946_v59 = vsel %vm3292_vm2, %v842_v40, %v914_v27  ;;  %v1688_v56 = vsel %vm1268_vm5, %v1680_v31, %v1544_v50 }
 0x1b9   : > { %1954 = vxpose.xlu1.b32.start [1/4] (short) %v1321_v16, 128  ;;  %v1844_v53 = vpop.trf.xlu1  ;;  %v1815_v34 = vpop.trf.xlu0  ;;  %v1664_v16 = vsel %vm1304_vm11, %v1656_v4, %v1480_v6  ;;  %v970_v21 = vsub.f32 0.0, %v938_v19  ;;  %v1010_v63 = vsub.f32 0.0, %v946_v59  ;;  %v1696_v3 = vsel %vm1277_vm7, %v1688_v56, %v1560_v38 }
 0x1ba   : > { %2037 = vst.msk [vmem:[%s2928_s27 + $0x190] sm:$0xff] %vm1986_vm3, %v1844_v53  ;;  %2024 = vst.msk [vmem:[%s2928_s27 + $0x128] sm:$0xff] %vm1986_vm3, %v1815_v34  ;;  %v1672_v20 = vsel %vm1313_vm12, %v1664_v16, %v1496_v17  ;;  %vm1002_vm8 = vcmp.eq.s32.totalorder %v994_v0, 2  ;;  %v1704_v28 = vsel %vm1286_vm9, %v1696_v3, %v1576_v26  ;;  %v1608_v12 = vrot.slane %v3288_v33, 1 }
 0x1bb   : > { %1924 = vxpose.xlu0.b32.cont [3/4] (short) %v1672_v20, 128  ;;  %v978_v30 = vsel %vm962_vm6, %v970_v21, %v938_v19  ;;  %v1018_v23 = vsel %vm1002_vm8, %v1010_v63, %v946_v59  ;;  %v1712_v62 = vsel %vm1295_vm10, %v1704_v28, %v1592_v57 }
 0x1bc   : > { %v1417_v48 = vrot.slane %v978_v30, 7  ;;  %v1433_v44 = vrot.slane %v1018_v23, 6  ;;  %v1720_v60 = vsel %vm1304_vm11, %v1712_v62, %v1608_v12  ;;  %v1513_v29 = vrot.slane %v978_v30, 4 }
 0x1bd   : > { %1955 = vxpose.xlu1.b32.cont [2/4] (short) %v1377_v25, 128  ;;  %v1845_v46 = vpop.trf.xlu1  ;;  %v1816_v10 = vpop.trf.xlu0  ;;  %v1393_v25 = vrot.slane %v1018_v23, 7  ;;  %v1728_v39 = vsel %vm1313_vm12, %v1720_v60, %v3290_v22  ;;  %v1529_v41 = vrot.slane %v1018_v23, 3  ;;  %v1449_v5 = vrot.slane %v978_v30, 6 }
 0x1be   : > { %2038 = vst.msk [vmem:[%s2928_s27 + $0x198] sm:$0xff] %vm1986_vm3, %v1845_v46  ;;  %2025 = vst.msk [vmem:[%s2928_s27 + $0x130] sm:$0xff] %vm1986_vm3, %v1816_v10  ;;  %v1545_v55 = vrot.slane %v978_v30, 3  ;;  %v1465_v9 = vrot.slane %v1018_v23, 5  ;;  %v1561_v36 = vrot.slane %v1018_v23, 2  ;;  %v1481_v54 = vrot.slane %v978_v30, 5 }
 0x1bf   : > { %v1625_v11 = vsel %vm1259_vm4, %v978_v30, %v1393_v25  ;;  %1925 = vxpose.xlu0.b32.end [4/4] (short) %v1728_v39, 128  ;;  %v1681_v1 = vsel %vm1259_vm4, %v1513_v29, %v1529_v41  ;;  %v1577_v49 = vrot.slane %v978_v30, 2  ;;  %v1497_v18 = vrot.slane %v1018_v23, 4 }
 0x1c0   : > { %v1633_v42 = vsel %vm1268_vm5, %v1625_v11, %v1417_v48  ;;  %v1689_v32 = vsel %vm1268_vm5, %v1681_v1, %v1545_v55  ;;  %v1593_v51 = vrot.slane %v1018_v23, 1  ;;  %v1609_v13 = vrot.slane %v978_v30, 1 }
 0x1c1   : > { %v1846_v15 = vpop.trf.xlu1  ;;  %v1817_v47 = vpop.trf.xlu0  ;;  %v1641_v43 = vsel %vm1277_vm7, %v1633_v42, %v1433_v44  ;;  %v1697_v45 = vsel %vm1277_vm7, %v1689_v32, %v1561_v36 }
 0x1c2   : > { %2039 = vst.msk [vmem:[%s2928_s27 + $0x1a0] sm:$0xff] %vm1986_vm3, %v1846_v15  ;;  %2026 = vst.msk [vmem:[%s2928_s27 + $0x138] sm:$0xff] %vm1986_vm3, %v1817_v47  ;;  %v1649_v22 = vsel %vm1286_vm9, %v1641_v43, %v1449_v5  ;;  %v1705_v37 = vsel %vm1286_vm9, %v1697_v45, %v1577_v49 }
 0x1c3   : > { %v1657_v0 = vsel %vm1295_vm10, %v1649_v22, %v1465_v9  ;;  %v1713_v61 = vsel %vm1295_vm10, %v1705_v37, %v1593_v51 }
 0x1c4   : > { %v1665_v52 = vsel %vm1304_vm11, %v1657_v0, %v1481_v54  ;;  %v1721_v34 = vsel %vm1304_vm11, %v1713_v61, %v1609_v13 }
 0x1c5   : > { %v1847_v33 = vpop.trf.xlu1  ;;  %v1818_v14 = vpop.trf.xlu0  ;;  %v1673_v35 = vsel %vm1313_vm12, %v1665_v52, %v1497_v18  ;;  %v1729_v6 = vsel %vm1313_vm12, %v1721_v34, %v1018_v23 }
 0x1c6   : > { %2040 = vst.msk [vmem:[%s2928_s27 + $0x1a8] sm:$0xff] %vm1986_vm3, %v1847_v33  ;;  %2027 = vst.msk [vmem:[%s2928_s27 + $0x140] sm:$0xff] %vm1986_vm3, %v1818_v14  ;;  %1956 = vxpose.xlu1.b32.cont [3/4] (short) %v1673_v35, 128 }
 0x1c9   : > { %v1848_v24 = vpop.trf.xlu1  ;;  %v1819_v53 = vpop.trf.xlu0 }
 0x1ca   : > { %2041 = vst.msk [vmem:[%s2928_s27 + $0x1b0] sm:$0xff] %vm1986_vm3, %v1848_v24  ;;  %2028 = vst.msk [vmem:[%s2928_s27 + $0x148] sm:$0xff] %vm1986_vm3, %v1819_v53  ;;  %1957 = vxpose.xlu1.b32.end [4/4] (short) %v1729_v6, 128 }
 0x1cd   : > { %v1849_v7 = vpop.trf.xlu1  ;;  %v1820_v40 = vpop.trf.xlu0 }
 0x1ce   : > { %2042 = vst.msk [vmem:[%s2928_s27 + $0x1b8] sm:$0xff] %vm1986_vm3, %v1849_v7  ;;  %2029 = vst.msk [vmem:[%s2928_s27 + $0x150] sm:$0xff] %vm1986_vm3, %v1820_v40 }
 0x1d1   : > { %v1850_v50 = vpop.trf.xlu1  ;;  %v1821_v17 = vpop.trf.xlu0 }
 0x1d2   : > { %2043 = vst.msk [vmem:[%s2928_s27 + $0x1c0] sm:$0xff] %vm1986_vm3, %v1850_v50  ;;  %2030 = vst.msk [vmem:[%s2928_s27 + $0x158] sm:$0xff] %vm1986_vm3, %v1821_v17 }
 0x1d5   : > { %v1851_v58 = vpop.trf.xlu1  ;;  %v1822_v27 = vpop.trf.xlu0 }
 0x1d6   : > { %2044 = vst.msk [vmem:[%s2928_s27 + $0x1c8] sm:$0xff] %vm1986_vm3, %v1851_v58  ;;  %2031 = vst.msk [vmem:[%s2928_s27 + $0x160] sm:$0xff] %vm1986_vm3, %v1822_v27 }
 0x1d9   : > { %v1852_v38 = vpop.trf.xlu1  ;;  %v1823_v8 = vpop.trf.xlu0 }
 0x1da   : > { %2045 = vst.msk [vmem:[%s2928_s27 + $0x1d0] sm:$0xff] %vm1986_vm3, %v1852_v38  ;;  %2032 = vst.msk [vmem:[%s2928_s27 + $0x168] sm:$0xff] %vm1986_vm3, %v1823_v8 }
 0x1dd   : > { %v1853_v26 = vpop.trf.xlu1  ;;  %v1824_v57 = vpop.trf.xlu0 }
 0x1de   : > { %2046 = vst.msk [vmem:[%s2928_s27 + $0x1d8] sm:$0xff] %vm1986_vm3, %v1853_v26  ;;  %2033 = vst.msk [vmem:[%s2928_s27 + $0x170] sm:$0xff] %vm1986_vm3, %v1824_v57 }
 0x1e1   : > { %v1854_v31 = vpop.trf.xlu1  ;;  %v1825_v4 = vpop.trf.xlu0 }
 0x1e2   : > { %2047 = vst.msk [vmem:[%s2928_s27 + $0x1e0] sm:$0xff] %vm1986_vm3, %v1854_v31  ;;  %2034 = vst.msk [vmem:[%s2928_s27 + $0x178] sm:$0xff] %vm1986_vm3, %v1825_v4 }
 0x1e5   : > { %v1855_v19 = vpop.trf.xlu1 }
 0x1e6   : > { %2048 = vst.msk [vmem:[%s2928_s27 + $0x1e8] sm:$0xff] %vm1986_vm3, %v1855_v19 }
 0x1e8   : > { %2229 = vset.pattern.permute.xlu0 %v2240_v2 }
 0x1e9   : > { %v1856_v59 = vpop.trf.xlu1 }
 0x1ea   : > { %2049 = vst.msk [vmem:[%s2928_s27 + $0x1f0] sm:$0xff] %vm1986_vm3, %v1856_v59 }
 0x1ed   : > { %v1857_v56 = vpop.trf.xlu1 }
 0x1ee   : > { %2050 = vst.msk [vmem:[%s2928_s27 + $0x1f8] sm:$0xff] %vm1986_vm3, %v1857_v56 }
 0x1f0   : > { %v1874_v46 = vpop.trf.xlu0 }
 0x1f1   : > { %2051 = vst.msk [vmem:[%s2928_s27 + $0x200] sm:$0xff] %vm1986_vm3, %v1874_v46 }
 0x1f4   : > { %v1875_v10 = vpop.trf.xlu0 }
 0x1f5   : > { %2052 = vst.msk [vmem:[%s2928_s27 + $0x208] sm:$0xff] %vm1986_vm3, %v1875_v10 }
 0x1f8   : > { %v1876_v16 = vpop.trf.xlu0 }
 0x1f9   : > { %2053 = vst.msk [vmem:[%s2928_s27 + $0x210] sm:$0xff] %vm1986_vm3, %v1876_v16 }
 0x1fc   : > { %v1906_v21 = vpop.trf.xlu1  ;;  %v1877_v63 = vpop.trf.xlu0 }
 0x1fd   : > { %2067 = vst.msk [vmem:[%s2928_s27 + $0x280] sm:$0xff] %vm1986_vm3, %v1906_v21  ;;  %2054 = vst.msk [vmem:[%s2928_s27 + $0x218] sm:$0xff] %vm1986_vm3, %v1877_v63 }
 0x200   : > { %v1907_v2 = vpop.trf.xlu1  ;;  %v1878_v3 = vpop.trf.xlu0 }
 0x201   : > { %2068 = vst.msk [vmem:[%s2928_s27 + $0x288] sm:$0xff] %vm1986_vm3, %v1907_v2  ;;  %2055 = vst.msk [vmem:[%s2928_s27 + $0x220] sm:$0xff] %vm1986_vm3, %v1878_v3 }
 0x204   : > { %v1908_v20 = vpop.trf.xlu1  ;;  %v1879_v28 = vpop.trf.xlu0 }
 0x205   : > { %2069 = vst.msk [vmem:[%s2928_s27 + $0x290] sm:$0xff] %vm1986_vm3, %v1908_v20  ;;  %2056 = vst.msk [vmem:[%s2928_s27 + $0x228] sm:$0xff] %vm1986_vm3, %v1879_v28 }
 0x208   : > { %v1909_v30 = vpop.trf.xlu1  ;;  %v1880_v23 = vpop.trf.xlu0 }
 0x209   : > { %2070 = vst.msk [vmem:[%s2928_s27 + $0x298] sm:$0xff] %vm1986_vm3, %v1909_v30  ;;  %2057 = vst.msk [vmem:[%s2928_s27 + $0x230] sm:$0xff] %vm1986_vm3, %v1880_v23 }
 0x20c   : > { %v1910_v12 = vpop.trf.xlu1  ;;  %v1881_v62 = vpop.trf.xlu0 }
 0x20d   : > { %2071 = vst.msk [vmem:[%s2928_s27 + $0x2a0] sm:$0xff] %vm1986_vm3, %v1910_v12  ;;  %2058 = vst.msk [vmem:[%s2928_s27 + $0x238] sm:$0xff] %vm1986_vm3, %v1881_v62 }
 0x210   : > { %v1911_v25 = vpop.trf.xlu1  ;;  %v1882_v48 = vpop.trf.xlu0 }
 0x211   : > { %2072 = vst.msk [vmem:[%s2928_s27 + $0x2a8] sm:$0xff] %vm1986_vm3, %v1911_v25  ;;  %2059 = vst.msk [vmem:[%s2928_s27 + $0x240] sm:$0xff] %vm1986_vm3, %v1882_v48 }
 0x214   : > { %v1912_v15 = vpop.trf.xlu1  ;;  %v1883_v47 = vpop.trf.xlu0 }
 0x215   : > { %2073 = vst.msk [vmem:[%s2928_s27 + $0x2b0] sm:$0xff] %vm1986_vm3, %v1912_v15  ;;  %2060 = vst.msk [vmem:[%s2928_s27 + $0x248] sm:$0xff] %vm1986_vm3, %v1883_v47 }
 0x218   : > { %v1913_v44 = vpop.trf.xlu1  ;;  %v1884_v60 = vpop.trf.xlu0 }
 0x219   : > { %2074 = vst.msk [vmem:[%s2928_s27 + $0x2b8] sm:$0xff] %vm1986_vm3, %v1913_v44  ;;  %2061 = vst.msk [vmem:[%s2928_s27 + $0x250] sm:$0xff] %vm1986_vm3, %v1884_v60 }
 0x21c   : > { %v1914_v11 = vpop.trf.xlu1  ;;  %v1885_v39 = vpop.trf.xlu0 }
 0x21d   : > { %2075 = vst.msk [vmem:[%s2928_s27 + $0x2c0] sm:$0xff] %vm1986_vm3, %v1914_v11  ;;  %2062 = vst.msk [vmem:[%s2928_s27 + $0x258] sm:$0xff] %vm1986_vm3, %v1885_v39 }
 0x220   : > { %v1915_v29 = vpop.trf.xlu1  ;;  %v1886_v41 = vpop.trf.xlu0 }
 0x221   : > { %2076 = vst.msk [vmem:[%s2928_s27 + $0x2c8] sm:$0xff] %vm1986_vm3, %v1915_v29  ;;  %2063 = vst.msk [vmem:[%s2928_s27 + $0x260] sm:$0xff] %vm1986_vm3, %v1886_v41 }
 0x224   : > { %v1916_v5 = vpop.trf.xlu1  ;;  %v1887_v42 = vpop.trf.xlu0 }
 0x225   : > { %2077 = vst.msk [vmem:[%s2928_s27 + $0x2d0] sm:$0xff] %vm1986_vm3, %v1916_v5  ;;  %2064 = vst.msk [vmem:[%s2928_s27 + $0x268] sm:$0xff] %vm1986_vm3, %v1887_v42 }
 0x228   : > { %v1917_v55 = vpop.trf.xlu1  ;;  %v1888_v9 = vpop.trf.xlu0 }
 0x229   : > { %2078 = vst.msk [vmem:[%s2928_s27 + $0x2d8] sm:$0xff] %vm1986_vm3, %v1917_v55  ;;  %2065 = vst.msk [vmem:[%s2928_s27 + $0x270] sm:$0xff] %vm1986_vm3, %v1888_v9 }
 0x22c   : > { %v1918_v43 = vpop.trf.xlu1  ;;  %v1889_v36 = vpop.trf.xlu0 }
 0x22d   : > { %2079 = vst.msk [vmem:[%s2928_s27 + $0x2e0] sm:$0xff] %vm1986_vm3, %v1918_v43  ;;  %2066 = vst.msk [vmem:[%s2928_s27 + $0x278] sm:$0xff] %vm1986_vm3, %v1889_v36 }
 0x230   : > { %v1919_v1 = vpop.trf.xlu1 }
 0x231   : > { %2080 = vst.msk [vmem:[%s2928_s27 + $0x2e8] sm:$0xff] %vm1986_vm3, %v1919_v1 }
 0x233   : > { %v1938_v54 = vpop.trf.xlu0 }
 0x234   : > { %v1920_v33 = vpop.trf.xlu1  ;;  %2083 = vst.msk [vmem:[%s2928_s27 + $0x300] sm:$0xff] %vm1986_vm3, %v1938_v54 }
 0x235   : > { %2081 = vst.msk [vmem:[%s2928_s27 + $0x2f0] sm:$0xff] %vm1986_vm3, %v1920_v33 }
 0x237   : > { %v1939_v22 = vpop.trf.xlu0 }
 0x238   : > { %v1921_v14 = vpop.trf.xlu1  ;;  %2084 = vst.msk [vmem:[%s2928_s27 + $0x308] sm:$0xff] %vm1986_vm3, %v1939_v22 }
 0x239   : > { %2082 = vst.msk [vmem:[%s2928_s27 + $0x2f8] sm:$0xff] %vm1986_vm3, %v1921_v14 }
 0x23b   : > { %v1940_v49 = vpop.trf.xlu0 }
 0x23c   : > { %2085 = vst.msk [vmem:[%s2928_s27 + $0x310] sm:$0xff] %vm1986_vm3, %v1940_v49 }
 0x23e   : > { %v1970_v32 = vpop.trf.xlu1 }
 0x23f   : > { %2099 = vst.msk [vmem:[%s2928_s27 + $0x380] sm:$0xff] %vm1986_vm3, %v1970_v32  ;;  %v1941_v18 = vpop.trf.xlu0 }
 0x240   : > { %2086 = vst.msk [vmem:[%s2928_s27 + $0x318] sm:$0xff] %vm1986_vm3, %v1941_v18 }
 0x242   : > { %v1971_v0 = vpop.trf.xlu1 }
 0x243   : > { %2100 = vst.msk [vmem:[%s2928_s27 + $0x388] sm:$0xff] %vm1986_vm3, %v1971_v0  ;;  %v1942_v51 = vpop.trf.xlu0 }
 0x244   : > { %2087 = vst.msk [vmem:[%s2928_s27 + $0x320] sm:$0xff] %vm1986_vm3, %v1942_v51 }
 0x246   : > { %v1972_v45 = vpop.trf.xlu1 }
 0x247   : > { %2101 = vst.msk [vmem:[%s2928_s27 + $0x390] sm:$0xff] %vm1986_vm3, %v1972_v45  ;;  %v1943_v52 = vpop.trf.xlu0 }
 0x248   : > { %2088 = vst.msk [vmem:[%s2928_s27 + $0x328] sm:$0xff] %vm1986_vm3, %v1943_v52 }
 0x24a   : > { %v1973_v13 = vpop.trf.xlu1 }
 0x24b   : > { %2102 = vst.msk [vmem:[%s2928_s27 + $0x398] sm:$0xff] %vm1986_vm3, %v1973_v13  ;;  %v1944_v37 = vpop.trf.xlu0 }
 0x24c   : > { %2089 = vst.msk [vmem:[%s2928_s27 + $0x330] sm:$0xff] %vm1986_vm3, %v1944_v37 }
 0x24e   : > { %v1974_v35 = vpop.trf.xlu1 }
 0x24f   : > { %2103 = vst.msk [vmem:[%s2928_s27 + $0x3a0] sm:$0xff] %vm1986_vm3, %v1974_v35  ;;  %v1945_v61 = vpop.trf.xlu0 }
 0x250   : > { %2090 = vst.msk [vmem:[%s2928_s27 + $0x338] sm:$0xff] %vm1986_vm3, %v1945_v61 }
 0x252   : > { %v1975_v24 = vpop.trf.xlu1 }
 0x253   : > { %2104 = vst.msk [vmem:[%s2928_s27 + $0x3a8] sm:$0xff] %vm1986_vm3, %v1975_v24  ;;  %v1946_v53 = vpop.trf.xlu0 }
 0x254   : > { %2091 = vst.msk [vmem:[%s2928_s27 + $0x340] sm:$0xff] %vm1986_vm3, %v1946_v53 }
 0x256   : > { %v1976_v34 = vpop.trf.xlu1 }
 0x257   : > { %2105 = vst.msk [vmem:[%s2928_s27 + $0x3b0] sm:$0xff] %vm1986_vm3, %v1976_v34  ;;  %v1947_v6 = vpop.trf.xlu0 }
 0x258   : > { %2092 = vst.msk [vmem:[%s2928_s27 + $0x348] sm:$0xff] %vm1986_vm3, %v1947_v6 }
 0x25a   : > { %v1977_v7 = vpop.trf.xlu1 }
 0x25b   : > { %2106 = vst.msk [vmem:[%s2928_s27 + $0x3b8] sm:$0xff] %vm1986_vm3, %v1977_v7  ;;  %v1948_v40 = vpop.trf.xlu0 }
 0x25c   : > { %2093 = vst.msk [vmem:[%s2928_s27 + $0x350] sm:$0xff] %vm1986_vm3, %v1948_v40 }
 0x25e   : > { %v1978_v50 = vpop.trf.xlu1 }
 0x25f   : > { %2107 = vst.msk [vmem:[%s2928_s27 + $0x3c0] sm:$0xff] %vm1986_vm3, %v1978_v50  ;;  %v1949_v17 = vpop.trf.xlu0 }
 0x260   : > { %2094 = vst.msk [vmem:[%s2928_s27 + $0x358] sm:$0xff] %vm1986_vm3, %v1949_v17 }
 0x262   : > { %v1979_v58 = vpop.trf.xlu1 }
 0x263   : > { %2108 = vst.msk [vmem:[%s2928_s27 + $0x3c8] sm:$0xff] %vm1986_vm3, %v1979_v58  ;;  %v1950_v27 = vpop.trf.xlu0 }
 0x264   : > { %2095 = vst.msk [vmem:[%s2928_s27 + $0x360] sm:$0xff] %vm1986_vm3, %v1950_v27 }
 0x266   : > { %v1980_v38 = vpop.trf.xlu1 }
 0x267   : > { %2109 = vst.msk [vmem:[%s2928_s27 + $0x3d0] sm:$0xff] %vm1986_vm3, %v1980_v38  ;;  %v1951_v8 = vpop.trf.xlu0 }
 0x268   : > { %2096 = vst.msk [vmem:[%s2928_s27 + $0x368] sm:$0xff] %vm1986_vm3, %v1951_v8 }
 0x26a   : > { %v1981_v26 = vpop.trf.xlu1 }
 0x26b   : > { %2110 = vst.msk [vmem:[%s2928_s27 + $0x3d8] sm:$0xff] %vm1986_vm3, %v1981_v26  ;;  %v1952_v57 = vpop.trf.xlu0 }
 0x26c   : > { %2097 = vst.msk [vmem:[%s2928_s27 + $0x370] sm:$0xff] %vm1986_vm3, %v1952_v57 }
 0x26e   : > { %v1982_v31 = vpop.trf.xlu1 }
 0x26f   : > { %2111 = vst.msk [vmem:[%s2928_s27 + $0x3e0] sm:$0xff] %vm1986_vm3, %v1982_v31  ;;  %v1953_v4 = vpop.trf.xlu0 }
 0x270   : > { %2098 = vst.msk [vmem:[%s2928_s27 + $0x378] sm:$0xff] %vm1986_vm3, %v1953_v4 }
 0x272   : > { %v1983_v19 = vpop.trf.xlu1 }
 0x273   : > { %2112 = vst.msk [vmem:[%s2928_s27 + $0x3e8] sm:$0xff] %vm1986_vm3, %v1983_v19 }
 0x276   : > { %v1984_v59 = vpop.trf.xlu1 }
 0x277   : > { %2113 = vst.msk [vmem:[%s2928_s27 + $0x3f0] sm:$0xff] %vm1986_vm3, %v1984_v59 }
 0x27a   : > { %v1985_v56 = vpop.trf.xlu1 }
 0x27b   : > { %2114 = vst.msk [vmem:[%s2928_s27 + $0x3f8] sm:$0xff] %vm1986_vm3, %v1985_v56 }
 0x27c PF: > { %s13_s12 = sadd.s32 1, %s2238_s12  }
 0x27d   : > { %p10_p5 = scmp.ge.s32.totalorder %s13_s12, 4  }
 0x27f   :  { %12 = sbr.rel (!%p10_p5) target bundleno = 1 (0x1), region = 62 }

</bundles_post_ra>
